<compile_context>
chip_gen: v7x
topology: tpu7x:2x2x1
jax: 0.10.0
libtpu: 0.0.40
codegen_flags: <defaults>
</compile_context>

<pallas_src>
import jax
import jax.numpy as jnp
from jax.experimental import pallas as pl
from jax.experimental.pallas import tpu as pltpu


def residual_block_pallas(x_nchw, params):
    """x_nchw: (N, Cin, H, W) float32 -> (N, Cout, H, W) float32."""
    N, Cin, H, W = x_nchw.shape
    (w1, b1, g1, be1, m1, v1, w2, b2, g2, be2, m2, v2,
     wd, bd, wf1, wf2) = params
    Cout = w1.shape[-1]
    Cr = wf1.shape[-1]
    HW = H * W
    eps = 1e-5
    f32 = jnp.float32

    # ---- fold conv bias + BN (inference) into per-channel scale/shift, fold
    #      the scale into the conv weights, transpose weights channels-first.
    s1 = g1 / jnp.sqrt(v1 + eps)
    t1 = be1 + (b1 - m1) * s1
    s2 = g2 / jnp.sqrt(v2 + eps)
    t2 = be2 + (b2 - m2) * s2
    # (Cout, 9*Cin): [co, (ky*3+kx)*Cin + ci] = w1[ky,kx,ci,co] * s1[co]
    w1t = jnp.transpose(w1 * s1, (3, 0, 1, 2)).reshape(Cout, 9 * Cin)
    # (9, Cout, Cout): [k, co, ci] = w2[ky,kx,ci,co] * s2[co],  k = ky*3+kx
    w2t = jnp.transpose(w2 * s2, (0, 1, 3, 2)).reshape(9, Cout, Cout)
    wdt = wd.T                                    # (Cout, Cin) 1x1 downsample
    t1c = t1.reshape(Cout, 1)
    t2c = (t2 + bd).reshape(Cout, 1)              # bn2 shift + downsample bias
    wf1t = wf1.T                                  # (Cr, Cout)
    wf2t = wf2.T                                  # (Cout, Cr)

    # ---- conv1 im2col at the XLA boundary (tiny: Cin=4), pre-transposed so
    #      the kernel's first matmul directly yields the lane-dense (Cout, HW).
    x_nhwc = jnp.transpose(x_nchw, (0, 2, 3, 1))
    x_pad = jnp.pad(x_nhwc, ((0, 0), (1, 1), (1, 1), (0, 0)))
    x1 = jnp.concatenate(
        [x_pad[:, ky:ky + H, kx:kx + W, :]
         for ky in range(3) for kx in range(3)],
        axis=-1).reshape(N * HW, 9 * Cin)
    x1t = x1.T                                    # (9*Cin, N*HW)

    # ---- per-tap validity masks: tap (dy,dx) at output pixel (y,x) reads
    #      (y+dy, x+dx); zero it outside the image (SAME zero padding).
    yy, xx = jnp.meshgrid(jnp.arange(H), jnp.arange(W), indexing="ij")
    yy = yy.reshape(-1)
    xx = xx.reshape(-1)
    tap_masks = jnp.stack(
        [((yy + dy >= 0) & (yy + dy < H) & (xx + dx >= 0) & (xx + dx < W))
         for dy in (-1, 0, 1) for dx in (-1, 0, 1)],
        axis=0).astype(f32)                       # (9, HW)

    def kernel(x1t_ref, w1t_ref, t1_ref, w2t_ref, t2_ref, wd_ref,
               wf1_ref, wf2_ref, msk_ref, o_ref):
        # conv1 (3x3) + bn1 + relu: one MXU matmul, result channels-first.
        h1 = jnp.dot(w1t_ref[...], x1t_ref[...],
                     preferred_element_type=f32)              # (Cout, HW)
        h1 = jnp.maximum(h1 + t1_ref[...], 0.0)

        # 1x1 downsample identity (+ bn2 shift + downsample bias): the center
        # tap of the conv1 patches is the original (unpadded) input pixel.
        acc = jnp.dot(wd_ref[...], x1t_ref[4 * Cin:5 * Cin, :],
                      preferred_element_type=f32) + t2_ref[...]

        # conv2 (3x3) + bn2: 9 accumulating MXU matmuls.  Each tap is a
        # circular lane shift of h1 (XLU slice+concat) times a {0,1} boundary
        # mask — no im2col scratch, no masked / misaligned stores.
        masks = msk_ref[...]                                  # (9, HW)
        k = 0
        for dy in (-1, 0, 1):
            for dx in (-1, 0, 1):
                d = dy * W + dx
                if d == 0:
                    tap = h1
                else:
                    # tap[:, m] = h1[:, (m + d) mod HW]; mask kills the wraps.
                    tap = jnp.concatenate([h1[:, d:], h1[:, :d]], axis=1)
                tap = tap * masks[k:k + 1, :]
                acc = acc + jnp.dot(w2t_ref[k], tap,
                                    preferred_element_type=f32)
                k += 1
        out = jnp.maximum(acc, 0.0)                           # (Cout, HW)

        # Squeeze-and-Excitation (one grid step == one image).
        pooled = jnp.mean(out, axis=1, keepdims=True)         # (Cout, 1)
        se = jnp.maximum(jnp.dot(wf1_ref[...], pooled,
                                 preferred_element_type=f32), 0.0)
        se = jax.nn.sigmoid(jnp.dot(wf2_ref[...], se,
                                    preferred_element_type=f32))  # (Cout, 1)

        # lane-dense (Cout, 256) store; NCHW is a free reshape outside.
        o_ref[0] = (out * se).astype(o_ref.dtype)

    out = pl.pallas_call(
        kernel,
        out_shape=jax.ShapeDtypeStruct((N, Cout, HW), f32),
        grid=(N,),
        in_specs=[
            pl.BlockSpec((9 * Cin, HW), lambda n: (0, n)),        # x1t (per image)
            pl.BlockSpec((Cout, 9 * Cin), lambda n: (0, 0)),      # w1t
            pl.BlockSpec((Cout, 1), lambda n: (0, 0)),            # bn1 shift
            pl.BlockSpec((9, Cout, Cout), lambda n: (0, 0, 0)),   # w2t (per tap)
            pl.BlockSpec((Cout, 1), lambda n: (0, 0)),            # bn2 shift + bd
            pl.BlockSpec((Cout, Cin), lambda n: (0, 0)),          # downsample^T
            pl.BlockSpec((Cr, Cout), lambda n: (0, 0)),           # SE fc1^T
            pl.BlockSpec((Cout, Cr), lambda n: (0, 0)),           # SE fc2^T
            pl.BlockSpec((9, HW), lambda n: (0, 0)),              # tap masks
        ],
        out_specs=pl.BlockSpec((1, Cout, HW), lambda n: (n, 0, 0)),
        compiler_params=pltpu.CompilerParams(
            dimension_semantics=("parallel",)),
    )(x1t, w1t, t1c, w2t, t2c, wdt, wf1t, wf2t, tap_masks)

    return out.reshape(N, Cout, H, W)


def reference_forward(x_nchw, params):
    """Pure-JAX reference (inference-mode BN), NCHW in/out."""
    (w1, b1, g1, be1, m1, v1, w2, b2, g2, be2, m2, v2,
     wd, bd, wf1, wf2) = params
    eps = 1e-5
    hi = jax.lax.Precision.HIGHEST
    x = jnp.transpose(x_nchw, (0, 2, 3, 1))  # NHWC

    def conv3(x, w, b):
        return jax.lax.conv_general_dilated(
            x, w, (1, 1), "SAME",
            dimension_numbers=("NHWC", "HWIO", "NHWC"), precision=hi) + b

    def bn(x, g, be, m, v):
        return (x - m) / jnp.sqrt(v + eps) * g + be

    out = jax.nn.relu(bn(conv3(x, w1, b1), g1, be1, m1, v1))
    out = bn(conv3(out, w2, b2), g2, be2, m2, v2)
    ident = jnp.einsum("nhwc,cd->nhwd", x, wd, precision=hi) + bd
    out = jax.nn.relu(out + ident)
    y = out.mean(axis=(1, 2))                       # (N, Cout)
    y = jax.nn.relu(y @ wf1)
    y = jax.nn.sigmoid(y @ wf2)
    out = out * y[:, None, None, :]
    return jnp.transpose(out, (0, 3, 1, 2))


def make_params(key, cin, cout, reduction=16):
    ks = jax.random.split(key, 8)
    cr = cout // reduction
    w1 = jax.random.normal(ks[0], (3, 3, cin, cout), jnp.float32) * 0.1
    b1 = jax.random.normal(ks[1], (cout,), jnp.float32) * 0.05
    g1 = 1.0 + 0.1 * jax.random.normal(ks[2], (cout,), jnp.float32)
    be1 = 0.05 * jax.random.normal(ks[3], (cout,), jnp.float32)
    m1 = 0.02 * jax.random.normal(ks[4], (cout,), jnp.float32)
    v1 = 1.0 + 0.1 * jnp.abs(jax.random.normal(ks[5], (cout,), jnp.float32))
    w2 = jax.random.normal(ks[6], (3, 3, cout, cout), jnp.float32) * 0.1
    b2 = jax.random.normal(ks[7], (cout,), jnp.float32) * 0.05
    ks = jax.random.split(ks[7], 10)
    g2 = 1.0 + 0.1 * jax.random.normal(ks[0], (cout,), jnp.float32)
    be2 = 0.05 * jax.random.normal(ks[1], (cout,), jnp.float32)
    m2 = 0.02 * jax.random.normal(ks[2], (cout,), jnp.float32)
    v2 = 1.0 + 0.1 * jnp.abs(jax.random.normal(ks[3], (cout,), jnp.float32))
    wd = jax.random.normal(ks[4], (cin, cout), jnp.float32) * 0.2
    bd = jax.random.normal(ks[5], (cout,), jnp.float32) * 0.05
    wf1 = jax.random.normal(ks[6], (cout, cr), jnp.float32) * 0.2
    wf2 = jax.random.normal(ks[7], (cr, cout), jnp.float32) * 0.2
    return (w1, b1, g1, be1, m1, v1, w2, b2, g2, be2, m2, v2, wd, bd, wf1, wf2)


if __name__ == "__main__":
    # ResidualBlock(in_channels=4, out_channels=32, add_attention=True)
    N, Cin, Cout, H, W = 2, 4, 32, 16, 16
    key = jax.random.PRNGKey(0)
    kx_, kp = jax.random.split(key)
    x = jax.random.normal(kx_, (N, Cin, H, W), jnp.float32)
    params = make_params(kp, Cin, Cout)

    fwd = jax.jit(residual_block_pallas)
    out = jax.block_until_ready(fwd(x, params))
    ref = jax.block_until_ready(reference_forward(x, params))

    assert out.shape == (N, Cout, H, W)
    err = float(jnp.max(jnp.abs(out - ref)))
    # f32 MXU accumulation lands ~1e-5; tolerance left with headroom for
    # toolchains that run f32 matmuls as bf16 passes.
    assert err < 2e-2, f"max abs err {err}"
    print("KERNEL_OK")
</pallas_src>

<mosaic_0001>
module attributes {stable_mosaic.version = 11 : i64} {
  func.func @kernel(%arg0: i32, %arg1: memref<36x256xf32, #tpu.memory_space<vmem>>, %arg2: memref<32x36xf32, #tpu.memory_space<vmem>>, %arg3: memref<32x1xf32, #tpu.memory_space<vmem>>, %arg4: memref<9x32x32xf32, #tpu.memory_space<vmem>>, %arg5: memref<32x1xf32, #tpu.memory_space<vmem>>, %arg6: memref<32x4xf32, #tpu.memory_space<vmem>>, %arg7: memref<2x32xf32, #tpu.memory_space<vmem>>, %arg8: memref<32x2xf32, #tpu.memory_space<vmem>>, %arg9: memref<9x256xf32, #tpu.memory_space<vmem>>, %arg10: memref<1x32x256xf32, #tpu.memory_space<vmem>>) attributes {dimension_semantics = [#tpu.dimension_semantics<parallel>], iteration_bounds = array<i64: 2>, scalar_prefetch = 0 : i64, scratch_operands = 0 : i64, tpu.core_type = #tpu.core_type<tc>, window_params = [{transform_indices = @transform_0, window_bounds = array<i64: 36, 256>}, {pipeline_mode = #tpu.pipeline_mode<synchronous>, transform_indices = @transform_1, window_bounds = array<i64: 32, 36>}, {pipeline_mode = #tpu.pipeline_mode<synchronous>, transform_indices = @transform_2, window_bounds = array<i64: 32, 1>}, {pipeline_mode = #tpu.pipeline_mode<synchronous>, transform_indices = @transform_3, window_bounds = array<i64: 9, 32, 32>}, {pipeline_mode = #tpu.pipeline_mode<synchronous>, transform_indices = @transform_4, window_bounds = array<i64: 32, 1>}, {pipeline_mode = #tpu.pipeline_mode<synchronous>, transform_indices = @transform_5, window_bounds = array<i64: 32, 4>}, {pipeline_mode = #tpu.pipeline_mode<synchronous>, transform_indices = @transform_6, window_bounds = array<i64: 2, 32>}, {pipeline_mode = #tpu.pipeline_mode<synchronous>, transform_indices = @transform_7, window_bounds = array<i64: 32, 2>}, {pipeline_mode = #tpu.pipeline_mode<synchronous>, transform_indices = @transform_8, window_bounds = array<i64: 9, 256>}, {transform_indices = @transform_9, window_bounds = array<i64: 1, 32, 256>}]} {
    %c0 = arith.constant 0 : index
    %c0_0 = arith.constant 0 : index
    %0 = vector.load %arg2[%c0, %c0_0] : memref<32x36xf32, #tpu.memory_space<vmem>>, vector<32x36xf32>
    %c0_1 = arith.constant 0 : index
    %c0_2 = arith.constant 0 : index
    %1 = vector.load %arg1[%c0_1, %c0_2] : memref<36x256xf32, #tpu.memory_space<vmem>>, vector<36x256xf32>
    %cst = arith.constant dense<0.000000e+00> : vector<32x256xf32>
    %2 = tpu.matmul %0, %1, %cst {dimension_numbers = #tpu.dot_dimension_numbers<[1], [0], [0], [1], [0, 0, 1, 1], [], []>} : vector<32x36xf32>, vector<36x256xf32>, vector<32x256xf32> -> vector<32x256xf32>
    %c0_3 = arith.constant 0 : index
    %c0_4 = arith.constant 0 : index
    %3 = vector.load %arg3[%c0_3, %c0_4] : memref<32x1xf32, #tpu.memory_space<vmem>>, vector<32x1xf32>
    %4 = vector.broadcast %3 : vector<32x1xf32> to vector<32x256xf32>
    %5 = arith.addf %2, %4 : vector<32x256xf32>
    %cst_5 = arith.constant 0.000000e+00 : f32
    %6 = vector.broadcast %cst_5 : f32 to vector<32x256xf32>
    %7 = arith.maximumf %5, %6 : vector<32x256xf32>
    %c0_6 = arith.constant 0 : index
    %c0_7 = arith.constant 0 : index
    %8 = vector.load %arg6[%c0_6, %c0_7] : memref<32x4xf32, #tpu.memory_space<vmem>>, vector<32x4xf32>
    %c16 = arith.constant 16 : index
    %c0_8 = arith.constant 0 : index
    %9 = vector.load %arg1[%c16, %c0_8] : memref<36x256xf32, #tpu.memory_space<vmem>>, vector<4x256xf32>
    %cst_9 = arith.constant dense<0.000000e+00> : vector<32x256xf32>
    %10 = tpu.matmul %8, %9, %cst_9 {dimension_numbers = #tpu.dot_dimension_numbers<[1], [0], [0], [1], [0, 0, 1, 1], [], []>} : vector<32x4xf32>, vector<4x256xf32>, vector<32x256xf32> -> vector<32x256xf32>
    %c0_10 = arith.constant 0 : index
    %c0_11 = arith.constant 0 : index
    %11 = vector.load %arg5[%c0_10, %c0_11] : memref<32x1xf32, #tpu.memory_space<vmem>>, vector<32x1xf32>
    %12 = vector.broadcast %11 : vector<32x1xf32> to vector<32x256xf32>
    %13 = arith.addf %10, %12 : vector<32x256xf32>
    %c0_12 = arith.constant 0 : index
    %c0_13 = arith.constant 0 : index
    %14 = vector.load %arg9[%c0_12, %c0_13] : memref<9x256xf32, #tpu.memory_space<vmem>>, vector<9x256xf32>
    %15 = vector.extract_strided_slice %7 {offsets = [0, 239], sizes = [32, 17], strides = [1, 1]} : vector<32x256xf32> to vector<32x17xf32>
    %16 = vector.extract_strided_slice %7 {offsets = [0, 0], sizes = [32, 239], strides = [1, 1]} : vector<32x256xf32> to vector<32x239xf32>
    %17 = tpu.concatenate %15, %16 in 1 : vector<32x17xf32>, vector<32x239xf32> -> vector<32x256xf32>
    %18 = vector.extract_strided_slice %14 {offsets = [0, 0], sizes = [1, 256], strides = [1, 1]} : vector<9x256xf32> to vector<1x256xf32>
    %19 = vector.broadcast %18 : vector<1x256xf32> to vector<32x256xf32>
    %20 = arith.mulf %17, %19 : vector<32x256xf32>
    %c0_14 = arith.constant 0 : index
    %c0_15 = arith.constant 0 : index
    %c0_16 = arith.constant 0 : index
    %21 = vector.load %arg4[%c0_14, %c0_15, %c0_16] : memref<9x32x32xf32, #tpu.memory_space<vmem>>, vector<1x32x32xf32>
    %22 = vector.shape_cast %21 : vector<1x32x32xf32> to vector<32x32xf32>
    %cst_17 = arith.constant dense<0.000000e+00> : vector<32x256xf32>
    %23 = tpu.matmul %22, %20, %cst_17 {dimension_numbers = #tpu.dot_dimension_numbers<[1], [0], [0], [1], [0, 0, 1, 1], [], []>} : vector<32x32xf32>, vector<32x256xf32>, vector<32x256xf32> -> vector<32x256xf32>
    %24 = arith.addf %13, %23 : vector<32x256xf32>
    %25 = vector.extract_strided_slice %7 {offsets = [0, 240], sizes = [32, 16], strides = [1, 1]} : vector<32x256xf32> to vector<32x16xf32>
    %26 = vector.extract_strided_slice %7 {offsets = [0, 0], sizes = [32, 240], strides = [1, 1]} : vector<32x256xf32> to vector<32x240xf32>
    %27 = tpu.concatenate %25, %26 in 1 : vector<32x16xf32>, vector<32x240xf32> -> vector<32x256xf32>
    %28 = vector.extract_strided_slice %14 {offsets = [1, 0], sizes = [1, 256], strides = [1, 1]} : vector<9x256xf32> to vector<1x256xf32>
    %29 = vector.broadcast %28 : vector<1x256xf32> to vector<32x256xf32>
    %30 = arith.mulf %27, %29 : vector<32x256xf32>
    %c1 = arith.constant 1 : index
    %c0_18 = arith.constant 0 : index
    %c0_19 = arith.constant 0 : index
    %31 = vector.load %arg4[%c1, %c0_18, %c0_19] : memref<9x32x32xf32, #tpu.memory_space<vmem>>, vector<1x32x32xf32>
    %32 = vector.shape_cast %31 : vector<1x32x32xf32> to vector<32x32xf32>
    %cst_20 = arith.constant dense<0.000000e+00> : vector<32x256xf32>
    %33 = tpu.matmul %32, %30, %cst_20 {dimension_numbers = #tpu.dot_dimension_numbers<[1], [0], [0], [1], [0, 0, 1, 1], [], []>} : vector<32x32xf32>, vector<32x256xf32>, vector<32x256xf32> -> vector<32x256xf32>
    %34 = arith.addf %24, %33 : vector<32x256xf32>
    %35 = vector.extract_strided_slice %7 {offsets = [0, 241], sizes = [32, 15], strides = [1, 1]} : vector<32x256xf32> to vector<32x15xf32>
    %36 = vector.extract_strided_slice %7 {offsets = [0, 0], sizes = [32, 241], strides = [1, 1]} : vector<32x256xf32> to vector<32x241xf32>
    %37 = tpu.concatenate %35, %36 in 1 : vector<32x15xf32>, vector<32x241xf32> -> vector<32x256xf32>
    %38 = vector.extract_strided_slice %14 {offsets = [2, 0], sizes = [1, 256], strides = [1, 1]} : vector<9x256xf32> to vector<1x256xf32>
    %39 = vector.broadcast %38 : vector<1x256xf32> to vector<32x256xf32>
    %40 = arith.mulf %37, %39 : vector<32x256xf32>
    %c2 = arith.constant 2 : index
    %c0_21 = arith.constant 0 : index
    %c0_22 = arith.constant 0 : index
    %41 = vector.load %arg4[%c2, %c0_21, %c0_22] : memref<9x32x32xf32, #tpu.memory_space<vmem>>, vector<1x32x32xf32>
    %42 = vector.shape_cast %41 : vector<1x32x32xf32> to vector<32x32xf32>
    %cst_23 = arith.constant dense<0.000000e+00> : vector<32x256xf32>
    %43 = tpu.matmul %42, %40, %cst_23 {dimension_numbers = #tpu.dot_dimension_numbers<[1], [0], [0], [1], [0, 0, 1, 1], [], []>} : vector<32x32xf32>, vector<32x256xf32>, vector<32x256xf32> -> vector<32x256xf32>
    %44 = arith.addf %34, %43 : vector<32x256xf32>
    %45 = vector.extract_strided_slice %7 {offsets = [0, 255], sizes = [32, 1], strides = [1, 1]} : vector<32x256xf32> to vector<32x1xf32>
    %46 = vector.extract_strided_slice %7 {offsets = [0, 0], sizes = [32, 255], strides = [1, 1]} : vector<32x256xf32> to vector<32x255xf32>
    %47 = tpu.concatenate %45, %46 in 1 : vector<32x1xf32>, vector<32x255xf32> -> vector<32x256xf32>
    %48 = vector.extract_strided_slice %14 {offsets = [3, 0], sizes = [1, 256], strides = [1, 1]} : vector<9x256xf32> to vector<1x256xf32>
    %49 = vector.broadcast %48 : vector<1x256xf32> to vector<32x256xf32>
    %50 = arith.mulf %47, %49 : vector<32x256xf32>
    %c3 = arith.constant 3 : index
    %c0_24 = arith.constant 0 : index
    %c0_25 = arith.constant 0 : index
    %51 = vector.load %arg4[%c3, %c0_24, %c0_25] : memref<9x32x32xf32, #tpu.memory_space<vmem>>, vector<1x32x32xf32>
    %52 = vector.shape_cast %51 : vector<1x32x32xf32> to vector<32x32xf32>
    %cst_26 = arith.constant dense<0.000000e+00> : vector<32x256xf32>
    %53 = tpu.matmul %52, %50, %cst_26 {dimension_numbers = #tpu.dot_dimension_numbers<[1], [0], [0], [1], [0, 0, 1, 1], [], []>} : vector<32x32xf32>, vector<32x256xf32>, vector<32x256xf32> -> vector<32x256xf32>
    %54 = arith.addf %44, %53 : vector<32x256xf32>
    %55 = vector.extract_strided_slice %14 {offsets = [4, 0], sizes = [1, 256], strides = [1, 1]} : vector<9x256xf32> to vector<1x256xf32>
    %56 = vector.broadcast %55 : vector<1x256xf32> to vector<32x256xf32>
    %57 = arith.mulf %7, %56 : vector<32x256xf32>
    %c4 = arith.constant 4 : index
    %c0_27 = arith.constant 0 : index
    %c0_28 = arith.constant 0 : index
    %58 = vector.load %arg4[%c4, %c0_27, %c0_28] : memref<9x32x32xf32, #tpu.memory_space<vmem>>, vector<1x32x32xf32>
    %59 = vector.shape_cast %58 : vector<1x32x32xf32> to vector<32x32xf32>
    %cst_29 = arith.constant dense<0.000000e+00> : vector<32x256xf32>
    %60 = tpu.matmul %59, %57, %cst_29 {dimension_numbers = #tpu.dot_dimension_numbers<[1], [0], [0], [1], [0, 0, 1, 1], [], []>} : vector<32x32xf32>, vector<32x256xf32>, vector<32x256xf32> -> vector<32x256xf32>
    %61 = arith.addf %54, %60 : vector<32x256xf32>
    %62 = vector.extract_strided_slice %7 {offsets = [0, 1], sizes = [32, 255], strides = [1, 1]} : vector<32x256xf32> to vector<32x255xf32>
    %63 = vector.extract_strided_slice %7 {offsets = [0, 0], sizes = [32, 1], strides = [1, 1]} : vector<32x256xf32> to vector<32x1xf32>
    %64 = tpu.concatenate %62, %63 in 1 : vector<32x255xf32>, vector<32x1xf32> -> vector<32x256xf32>
    %65 = vector.extract_strided_slice %14 {offsets = [5, 0], sizes = [1, 256], strides = [1, 1]} : vector<9x256xf32> to vector<1x256xf32>
    %66 = vector.broadcast %65 : vector<1x256xf32> to vector<32x256xf32>
    %67 = arith.mulf %64, %66 : vector<32x256xf32>
    %c5 = arith.constant 5 : index
    %c0_30 = arith.constant 0 : index
    %c0_31 = arith.constant 0 : index
    %68 = vector.load %arg4[%c5, %c0_30, %c0_31] : memref<9x32x32xf32, #tpu.memory_space<vmem>>, vector<1x32x32xf32>
    %69 = vector.shape_cast %68 : vector<1x32x32xf32> to vector<32x32xf32>
    %cst_32 = arith.constant dense<0.000000e+00> : vector<32x256xf32>
    %70 = tpu.matmul %69, %67, %cst_32 {dimension_numbers = #tpu.dot_dimension_numbers<[1], [0], [0], [1], [0, 0, 1, 1], [], []>} : vector<32x32xf32>, vector<32x256xf32>, vector<32x256xf32> -> vector<32x256xf32>
    %71 = arith.addf %61, %70 : vector<32x256xf32>
    %72 = vector.extract_strided_slice %7 {offsets = [0, 15], sizes = [32, 241], strides = [1, 1]} : vector<32x256xf32> to vector<32x241xf32>
    %73 = vector.extract_strided_slice %7 {offsets = [0, 0], sizes = [32, 15], strides = [1, 1]} : vector<32x256xf32> to vector<32x15xf32>
    %74 = tpu.concatenate %72, %73 in 1 : vector<32x241xf32>, vector<32x15xf32> -> vector<32x256xf32>
    %75 = vector.extract_strided_slice %14 {offsets = [6, 0], sizes = [1, 256], strides = [1, 1]} : vector<9x256xf32> to vector<1x256xf32>
    %76 = vector.broadcast %75 : vector<1x256xf32> to vector<32x256xf32>
    %77 = arith.mulf %74, %76 : vector<32x256xf32>
    %c6 = arith.constant 6 : index
    %c0_33 = arith.constant 0 : index
    %c0_34 = arith.constant 0 : index
    %78 = vector.load %arg4[%c6, %c0_33, %c0_34] : memref<9x32x32xf32, #tpu.memory_space<vmem>>, vector<1x32x32xf32>
    %79 = vector.shape_cast %78 : vector<1x32x32xf32> to vector<32x32xf32>
    %cst_35 = arith.constant dense<0.000000e+00> : vector<32x256xf32>
    %80 = tpu.matmul %79, %77, %cst_35 {dimension_numbers = #tpu.dot_dimension_numbers<[1], [0], [0], [1], [0, 0, 1, 1], [], []>} : vector<32x32xf32>, vector<32x256xf32>, vector<32x256xf32> -> vector<32x256xf32>
    %81 = arith.addf %71, %80 : vector<32x256xf32>
    %82 = vector.extract_strided_slice %7 {offsets = [0, 16], sizes = [32, 240], strides = [1, 1]} : vector<32x256xf32> to vector<32x240xf32>
    %83 = vector.extract_strided_slice %7 {offsets = [0, 0], sizes = [32, 16], strides = [1, 1]} : vector<32x256xf32> to vector<32x16xf32>
    %84 = tpu.concatenate %82, %83 in 1 : vector<32x240xf32>, vector<32x16xf32> -> vector<32x256xf32>
    %85 = vector.extract_strided_slice %14 {offsets = [7, 0], sizes = [1, 256], strides = [1, 1]} : vector<9x256xf32> to vector<1x256xf32>
    %86 = vector.broadcast %85 : vector<1x256xf32> to vector<32x256xf32>
    %87 = arith.mulf %84, %86 : vector<32x256xf32>
    %c7 = arith.constant 7 : index
    %c0_36 = arith.constant 0 : index
    %c0_37 = arith.constant 0 : index
    %88 = vector.load %arg4[%c7, %c0_36, %c0_37] : memref<9x32x32xf32, #tpu.memory_space<vmem>>, vector<1x32x32xf32>
    %89 = vector.shape_cast %88 : vector<1x32x32xf32> to vector<32x32xf32>
    %cst_38 = arith.constant dense<0.000000e+00> : vector<32x256xf32>
    %90 = tpu.matmul %89, %87, %cst_38 {dimension_numbers = #tpu.dot_dimension_numbers<[1], [0], [0], [1], [0, 0, 1, 1], [], []>} : vector<32x32xf32>, vector<32x256xf32>, vector<32x256xf32> -> vector<32x256xf32>
    %91 = arith.addf %81, %90 : vector<32x256xf32>
    %92 = vector.extract_strided_slice %7 {offsets = [0, 17], sizes = [32, 239], strides = [1, 1]} : vector<32x256xf32> to vector<32x239xf32>
    %93 = vector.extract_strided_slice %7 {offsets = [0, 0], sizes = [32, 17], strides = [1, 1]} : vector<32x256xf32> to vector<32x17xf32>
    %94 = tpu.concatenate %92, %93 in 1 : vector<32x239xf32>, vector<32x17xf32> -> vector<32x256xf32>
    %95 = vector.extract_strided_slice %14 {offsets = [8, 0], sizes = [1, 256], strides = [1, 1]} : vector<9x256xf32> to vector<1x256xf32>
    %96 = vector.broadcast %95 : vector<1x256xf32> to vector<32x256xf32>
    %97 = arith.mulf %94, %96 : vector<32x256xf32>
    %c8 = arith.constant 8 : index
    %c0_39 = arith.constant 0 : index
    %c0_40 = arith.constant 0 : index
    %98 = vector.load %arg4[%c8, %c0_39, %c0_40] : memref<9x32x32xf32, #tpu.memory_space<vmem>>, vector<1x32x32xf32>
    %99 = vector.shape_cast %98 : vector<1x32x32xf32> to vector<32x32xf32>
    %cst_41 = arith.constant dense<0.000000e+00> : vector<32x256xf32>
    %100 = tpu.matmul %99, %97, %cst_41 {dimension_numbers = #tpu.dot_dimension_numbers<[1], [0], [0], [1], [0, 0, 1, 1], [], []>} : vector<32x32xf32>, vector<32x256xf32>, vector<32x256xf32> -> vector<32x256xf32>
    %101 = arith.addf %91, %100 : vector<32x256xf32>
    %cst_42 = arith.constant 0.000000e+00 : f32
    %102 = vector.broadcast %cst_42 : f32 to vector<32x256xf32>
    %103 = arith.maximumf %101, %102 : vector<32x256xf32>
    %cst_43 = arith.constant dense<0.000000e+00> : vector<32xf32>
    %104 = vector.multi_reduction <add>, %103, %cst_43 [1] : vector<32x256xf32> to vector<32xf32>
    %105 = vector.shape_cast %104 : vector<32xf32> to vector<32x1xf32>
    %cst_44 = arith.constant 2.560000e+02 : f32
    %106 = vector.broadcast %cst_44 : f32 to vector<32x1xf32>
    %107 = arith.divf %105, %106 : vector<32x1xf32>
    %c0_45 = arith.constant 0 : index
    %c0_46 = arith.constant 0 : index
    %108 = vector.load %arg7[%c0_45, %c0_46] : memref<2x32xf32, #tpu.memory_space<vmem>>, vector<2x32xf32>
    %cst_47 = arith.constant dense<0.000000e+00> : vector<2x1xf32>
    %109 = tpu.matmul %108, %107, %cst_47 {dimension_numbers = #tpu.dot_dimension_numbers<[1], [0], [0], [1], [0, 0, 1, 1], [], []>} : vector<2x32xf32>, vector<32x1xf32>, vector<2x1xf32> -> vector<2x1xf32>
    %cst_48 = arith.constant 0.000000e+00 : f32
    %110 = vector.broadcast %cst_48 : f32 to vector<2x1xf32>
    %111 = arith.maximumf %109, %110 : vector<2x1xf32>
    %c0_49 = arith.constant 0 : index
    %c0_50 = arith.constant 0 : index
    %112 = vector.load %arg8[%c0_49, %c0_50] : memref<32x2xf32, #tpu.memory_space<vmem>>, vector<32x2xf32>
    %cst_51 = arith.constant dense<0.000000e+00> : vector<32x1xf32>
    %113 = tpu.matmul %112, %111, %cst_51 {dimension_numbers = #tpu.dot_dimension_numbers<[1], [0], [0], [1], [0, 0, 1, 1], [], []>} : vector<32x2xf32>, vector<2x1xf32>, vector<32x1xf32> -> vector<32x1xf32>
    %114 = arith.negf %113 : vector<32x1xf32>
    %115 = math.exp %114 : vector<32x1xf32>
    %cst_52 = arith.constant 1.000000e+00 : f32
    %116 = vector.broadcast %cst_52 : f32 to vector<32x1xf32>
    %117 = arith.addf %116, %115 : vector<32x1xf32>
    %118 = arith.divf %116, %117 : vector<32x1xf32>
    %119 = vector.broadcast %118 : vector<32x1xf32> to vector<32x256xf32>
    %120 = arith.mulf %103, %119 : vector<32x256xf32>
    %c0_53 = arith.constant 0 : index
    %c0_54 = arith.constant 0 : index
    %c0_55 = arith.constant 0 : index
    %121 = vector.load %arg10[%c0_53, %c0_54, %c0_55] : memref<1x32x256xf32, #tpu.memory_space<vmem>>, vector<1x32x256xf32>
    %122 = vector.shape_cast %121 : vector<1x32x256xf32> to vector<32x256xf32>
    %123 = vector.shape_cast %120 : vector<32x256xf32> to vector<1x32x256xf32>
    tpu.vector_store %arg10[%c0_53, %c0_54, %c0_55], %123 {strides = array<i32>} : memref<1x32x256xf32, #tpu.memory_space<vmem>>, vector<1x32x256xf32>,
    return
  }
  func.func @transform_0(%arg0: i32) -> (i32, i32) {
    %c0_i32 = arith.constant 0 : i32
    %c0_i32_0 = arith.constant 0 : i32
    return %c0_i32, %arg0 : i32, i32
  }
  func.func @transform_1(%arg0: i32) -> (i32, i32) {
    %c0_i32 = arith.constant 0 : i32
    %c0_i32_0 = arith.constant 0 : i32
    %c0_i32_1 = arith.constant 0 : i32
    return %c0_i32, %c0_i32_0 : i32, i32
  }
  func.func @transform_2(%arg0: i32) -> (i32, i32) {
    %c0_i32 = arith.constant 0 : i32
    %c0_i32_0 = arith.constant 0 : i32
    %c0_i32_1 = arith.constant 0 : i32
    return %c0_i32, %c0_i32_0 : i32, i32
  }
  func.func @transform_3(%arg0: i32) -> (i32, i32, i32) {
    %c0_i32 = arith.constant 0 : i32
    %c0_i32_0 = arith.constant 0 : i32
    %c0_i32_1 = arith.constant 0 : i32
    %c0_i32_2 = arith.constant 0 : i32
    return %c0_i32, %c0_i32_0, %c0_i32_1 : i32, i32, i32
  }
  func.func @transform_4(%arg0: i32) -> (i32, i32) {
    %c0_i32 = arith.constant 0 : i32
    %c0_i32_0 = arith.constant 0 : i32
    %c0_i32_1 = arith.constant 0 : i32
    return %c0_i32, %c0_i32_0 : i32, i32
  }
  func.func @transform_5(%arg0: i32) -> (i32, i32) {
    %c0_i32 = arith.constant 0 : i32
    %c0_i32_0 = arith.constant 0 : i32
    %c0_i32_1 = arith.constant 0 : i32
    return %c0_i32, %c0_i32_0 : i32, i32
  }
  func.func @transform_6(%arg0: i32) -> (i32, i32) {
    %c0_i32 = arith.constant 0 : i32
    %c0_i32_0 = arith.constant 0 : i32
    %c0_i32_1 = arith.constant 0 : i32
    return %c0_i32, %c0_i32_0 : i32, i32
  }
  func.func @transform_7(%arg0: i32) -> (i32, i32) {
    %c0_i32 = arith.constant 0 : i32
    %c0_i32_0 = arith.constant 0 : i32
    %c0_i32_1 = arith.constant 0 : i32
    return %c0_i32, %c0_i32_0 : i32, i32
  }
  func.func @transform_8(%arg0: i32) -> (i32, i32) {
    %c0_i32 = arith.constant 0 : i32
    %c0_i32_0 = arith.constant 0 : i32
    %c0_i32_1 = arith.constant 0 : i32
    return %c0_i32, %c0_i32_0 : i32, i32
  }
  func.func @transform_9(%arg0: i32) -> (i32, i32, i32) {
    %c0_i32 = arith.constant 0 : i32
    %c0_i32_0 = arith.constant 0 : i32
    %c0_i32_1 = arith.constant 0 : i32
    return %arg0, %c0_i32, %c0_i32_0 : i32, i32, i32
  }
}

</mosaic_0001>

<bundles_post_ra>
// kernel: residual_block_pallas.1
= control target key start
LH: loop header
LB: loop body
LE: loop exit
PB: predicated region body
PF: predicated region fallthrough
CT: control target
= control target key end

     0   :  { %s2912_s30 = smov 0   ;;  %s2914_s10 = smov 0   ;;  %s3765_s0 = inlined_call_operand.vmem [shape: f32[36,512], index: 0, kind: input, shape index: {}]   ;;  %s3766_s1 = inlined_call_operand.vmem [shape: f32[32,36], index: 1, kind: input, shape index: {}]   ;;  %s3767_s2 = inlined_call_operand.vmem [shape: f32[32,1], index: 2, kind: input, shape index: {}]   ;;  %s3768_s3 = inlined_call_operand.vmem [shape: f32[9,32,32], index: 3, kind: input, shape index: {}]   ;;  %s3769_s4 = inlined_call_operand.vmem [shape: f32[32,1], index: 4, kind: input, shape index: {}]   ;;  %s3770_s5 = inlined_call_operand.vmem [shape: f32[32,4], index: 5, kind: input, shape index: {}]   ;;  %s3771_s6 = inlined_call_operand.vmem [shape: f32[2,32], index: 6, kind: input, shape index: {}]   ;;  %s3772_s7 = inlined_call_operand.vmem [shape: f32[32,2], index: 7, kind: input, shape index: {}]   ;;  %s3773_s8 = inlined_call_operand.vmem [shape: f32[9,256], index: 8, kind: input, shape index: {}]   ;;  %s3774_s9 = inlined_call_operand.vmem [shape: f32[2,32,256], index: 9, kind: output, shape index: {}]  }
   0x1   :  { %s2916_s11 = smov 0  }
   0x2 LB: > { %s2470_s12 = sadd.s32 4294967295, %s2848_s11   ;;  %s2929_s13 = sadd.s32 1, %s2848_s11   ;;  %s2848_s11 = sphi %s2916_s11, %s3779_s11   ;;  %s2844_s10 = sphi %s2914_s10, %s3778_s10   ;;  %s2840_s30 = sphi %s2912_s30, %s3777_s30  }
   0x3   : > { %s23_s14 = ssub.s32 %s2848_s11, %s2929_s13  ;;  %s26_s15 = sadd.s32 1, %s2844_s10 }
   0x4   : > { %p24_p0 = scmp.eq.s32.totalorder %s23_s14, 0  ;;  %p33_p1 = scmp.ne.s32.totalorder %s2844_s10, %s2840_s30 }
   0x5   : > { %p34_p2 = scmp.eq.s32.totalorder %s2848_s11, 0  ;;  %p2473_p4 = scmp.ge.s32.totalorder %s2848_s11, 2 }
   0x6   : > { %s2938_s16 = scalar_select %p24_p0, %s2844_s10, %s26_s15  }
   0x7   : > { %p35_p3 = por %p34_p2, %p33_p1  ;;  %277 = sbr.rel (%p2473_p4) target bundleno = 23 (0x17), region = 48 }
   0xe   : > { %280 = sbr.rel (!%p35_p3) target bundleno = 23 (0x17), region = 52  ;;  %s282_s17 = sand.u32 (%p35_p3), 1, %s2844_s10  }
   0xf   : > { %s2573_s18 = sshll.u32 (%p35_p3), %s2848_s11, 4  ;;  %s2770_s19 = smul.u32 (%p35_p3), 80, %s282_s17 }
  0x10   : > { %s287_s22 = scalar_lea.vmem (%p35_p3), %s3765_s0, %s2573_s18 }
  0x11   : > { %v300_v0 = vld [vmem:[%s287_s22] sm:$0xff] (%p35_p3)  ;;  %v302_v1 = vld [vmem:[%s287_s22 + $0x8] sm:$0xff] (%p35_p3)  ;;  %s284_s23 = scalar_lea.vmem (%p35_p3), [#allocation2], %s2770_s19 }
  0x12   : > { %v304_v2 = vld [vmem:[%s287_s22 + $0x20] sm:$0xff] (%p35_p3)  ;;  %v306_v3 = vld [vmem:[%s287_s22 + $0x28] sm:$0xff] (%p35_p3)  ;;  %301 = vst [vmem:[%s284_s23] sm:$0xff] (%p35_p3), %v300_v0  ;;  %303 = vst [vmem:[%s284_s23 + $0x8] sm:$0xff] (%p35_p3), %v302_v1 }
  0x13   : > { %v308_v4 = vld [vmem:[%s287_s22 + $0x40] sm:$0xff] (%p35_p3)  ;;  %v310_v5 = vld [vmem:[%s287_s22 + $0x48] sm:$0xff] (%p35_p3)  ;;  %305 = vst [vmem:[%s284_s23 + $0x10] sm:$0xff] (%p35_p3), %v304_v2  ;;  %307 = vst [vmem:[%s284_s23 + $0x18] sm:$0xff] (%p35_p3), %v306_v3 }
  0x14   : > { %309 = vst [vmem:[%s284_s23 + $0x20] sm:$0xff] (%p35_p3), %v308_v4  ;;  %311 = vst [vmem:[%s284_s23 + $0x28] sm:$0xff] (%p35_p3), %v310_v5  ;;  %v312_v6 = vld [vmem:[%s287_s22 + $0x60] sm:$0xff] (%p35_p3)  ;;  %v314_v7 = vld [vmem:[%s287_s22 + $0x68] sm:$0xff] (%p35_p3) }
  0x15   : > { %v316_v8 = vld [vmem:[%s287_s22 + $0x80] sm:$0xff]  ;;  %313 = vst [vmem:[%s284_s23 + $0x30] sm:$0xff] %v312_v6  ;;  %315 = vst [vmem:[%s284_s23 + $0x38] sm:$0xff] %v314_v7  ;;  %v318_v9 = vld [vmem:[%s287_s22 + $0x88] sm:$0xff] }
  0x16   : > { %317 = vst [vmem:[%s284_s23 + $0x40] sm:$0xff] %v316_v8  ;;  %319 = vst [vmem:[%s284_s23 + $0x48] sm:$0xff] %v318_v9 }
  0x17 PF: > { %p2476_p5 = scmp.ge.s32.totalorder %s2848_s11, 1  ;;  %p324_p6 = scmp.lt.s32.totalorder %s2848_s11, 3 }
  0x19   : > { %p325_p7 = pnand %p2476_p5, %p324_p6 }
  0x1a   : > { %s331_s24 = sand.u32 (!%p325_p7), 1, %s2840_s30   ;;  %v2850_v10 = vmov (!%p325_p7), 0.0   ;;  %v386_v11 = vld [vmem:[%s3767_s2] sm:$0xff] (!%p325_p7)  ;;  %v2851_v12 = vmov (!%p325_p7), 0   ;;  %v388_v13 = vld [vmem:[%s3767_s2 + $0x10] sm:$0xff] (!%p325_p7)  ;;  %v387_v14 = vld [vmem:[%s3767_s2 + $0x8] sm:$0xff] (!%p325_p7)  ;;  %v714_v40 = vlaneseq (!%p325_p7) }
  0x1b   : > { %328 = sbr.rel (%p325_p7) target bundleno = 1484 (0x5cc), region = 75  ;;  %494 = vmatprep.mubr.f32.mxu0 (!%p325_p7), %v2850_v10  ;;  %640 = vmatprep.mubr.f32.mxu1 (!%p325_p7), %v2850_v10  ;;  %v389_v15 = vld [vmem:[%s3767_s2 + $0x18] sm:$0xff] (!%p325_p7)  ;;  %vm423_vm0 = vcmask (!%p325_p7), 1043456   ;;  %v372_v30 = vld [vmem:[%s3766_s1] sm:$0xff] (!%p325_p7)  ;;  %vm410_vm1 = vcmask (!%p325_p7), 293888   ;;  %v373_v31 = vld [vmem:[%s3766_s1 + $0x8] sm:$0xff] (!%p325_p7) }
  0x1c   : > { %s2771_s25 = smul.u32 (!%p325_p7), 80, %s331_s24  ;;  %2808 = vset.pattern.permute.xlu0 (!%p325_p7), %v2851_v12  ;;  %2809 = vset.pattern.permute.xlu1 (!%p325_p7), %v2851_v12  ;;  %v374_v32 = vld [vmem:[%s3766_s1 + $0x10] sm:$0xff] (!%p325_p7)  ;;  %v375_v33 = vld [vmem:[%s3766_s1 + $0x18] sm:$0xff] (!%p325_p7)  ;;  %v527_v36 = vld [vmem:[%s3770_s5] sm:$0xff] (!%p325_p7)  ;;  %vm557_vm2 = vcmask (!%p325_p7), 31744   ;;  %v3013_v42 = vshrl.u32 (!%p325_p7), %v714_v40, 7 }
  0x1d   : > { %392 = vperm.xlu0 (!%p325_p7), %2808, %v386_v11   ;;  %402 = vperm.xlu1 (!%p325_p7), %2809, %v388_v13   ;;  %v528_v37 = vld [vmem:[%s3770_s5 + $0x8] sm:$0xff] (!%p325_p7)  ;;  %v529_v38 = vld [vmem:[%s3770_s5 + $0x10] sm:$0xff] (!%p325_p7)  ;;  %v530_v39 = vld [vmem:[%s3770_s5 + $0x18] sm:$0xff] (!%p325_p7)  ;;  %s2852_s23 = smov (!%p325_p7), 17   ;;  %s2853_s24 = smov (!%p325_p7), 127   ;;  %vm734_vm3 = vcmask (!%p325_p7), 261120  }
  0x1e   : > { %s2963_s18 = scalar_lea.vmem (!%p325_p7), [#allocation2], %s2771_s25  ;;  %v1347_v47 = vsub.s32 (!%p325_p7), 4, %v3013_v42  ;;  %v3021_v50 = vld [vmem:[%s3773_s8 + $0x8] sm:$0xff] (!%p325_p7)  ;;  %v3028_v53 = vld [vmem:[%s3773_s8] sm:$0xff] (!%p325_p7)  ;;  %s2854_s25 = smov (!%p325_p7), 113   ;;  %vm1658_vm4 = vcmask (!%p325_p7), 924672  }
  0x1f   : > { %v377_v16 = vld [vmem:[%s2963_s18 + $0x8] sm:$0xff] (!%p325_p7)  ;;  %v379_v17 = vld [vmem:[%s2963_s18 + $0x18] sm:$0xff] (!%p325_p7)  ;;  %v376_v18 = vld [vmem:[%s2963_s18] sm:$0xff] (!%p325_p7)  ;;  %s2855_s26 = smov (!%p325_p7), 16   ;;  %s2856_s27 = smov (!%p325_p7), 112   ;;  %vm1825_vm5 = vcmask (!%p325_p7), 916480  }
  0x20   : > { %v2604_v19 = vpack.c.bf16 (!%p325_p7), %v379_v17, %v377_v16  ;;  %v378_v20 = vld [vmem:[%s2963_s18 + $0x10] sm:$0xff] (!%p325_p7)  ;;  %v381_v21 = vld [vmem:[%s2963_s18 + $0x28] sm:$0xff] (!%p325_p7)  ;;  %v383_v22 = vld [vmem:[%s2963_s18 + $0x38] sm:$0xff] (!%p325_p7)  ;;  %v1352_v58 = vrot.slane (!%p325_p7), %v3021_v50, %v1347_v47  ;;  %v1348_v60 = vrot.slane (!%p325_p7), %v3028_v53, %v1347_v47  ;;  %s2857_s28 = smov (!%p325_p7), 15   ;;  %s2858_s21 = smov (!%p325_p7), 1   ;;  %vm697_vm6 = vcmask (!%p325_p7), 138240  }
  0x21   : > { %v2606_v23 = vpack.c.bf16 (!%p325_p7), %v378_v20, %v376_v18  ;;  %v2608_v24 = vpack.c.bf16 (!%p325_p7), %v383_v22, %v381_v21  ;;  %v380_v25 = vld [vmem:[%s2963_s18 + $0x20] sm:$0xff] (!%p325_p7)  ;;  %v382_v26 = vld [vmem:[%s2963_s18 + $0x30] sm:$0xff] (!%p325_p7)  ;;  %397 = vperm.xlu0 (!%p325_p7), %2808, %v387_v14   ;;  %407 = vperm.xlu1 (!%p325_p7), %2809, %v389_v15   ;;  %v385_v28 = vld [vmem:[%s2963_s18 + $0x48] sm:$0xf] (!%p325_p7)  ;;  %s2859_s22 = smov (!%p325_p7), 111   ;;  %vm1491_vm7 = vcmask (!%p325_p7), 1039360  }
  0x22   : > { %2605 = vmatprep.subr.bf16.mxu0 %v2604_v19  ;;  %v2610_v27 = vpack.c.bf16 %v382_v26, %v380_v25  ;;  %v384_v29 = vld [vmem:[%s2963_s18 + $0x40] sm:$0xf]  ;;  %v532_v34 = vld [vmem:[%s2963_s18 + $0x28] sm:$0xf]  ;;  %vm1031_vm8 = vcmask 121856   ;;  %vm864_vm9 = vcmask 130048  }
  0x23   : > { %2607 = vmatpush1.bf16.msra.mxu0 %v2606_v23  ;;  %v531_v35 = vld [vmem:[%s2963_s18 + $0x20] sm:$0xf]  ;;  %2485 = vmatprep.subr.msk.mxu1 %vm423_vm0, %v532_v34  ;;  %v2520_v25 = vld [vmem:[%s3768_s3 + $0x88] sm:$0xff]  ;;  %vm1198_vm10 = vcmask 7168   ;;  %vm1992_vm11 = vcmask 908288   ;;  %vm2861_vm12 = vmmov 0  }
  0x24   : > { %2609 = vmatprep.subr.bf16.mxu0 %v2608_v24  ;;  %2486 = vmatpush1.msk.msra.mxu1 %vm423_vm0, %v531_v35  ;;  %v2519_v24 = vld [vmem:[%s3768_s3 + $0x80] sm:$0xff]  ;;  %v2521_v26 = vld [vmem:[%s3768_s3 + $0x90] sm:$0xff]  ;;  %vm2247_vm13 = vcmask 15360   ;;  %vm2260_vm14 = vcmask 1041408   ;;  %p367_p8 = scmp.lt.s32.totalorder %s2470_s12, 1 }
  0x25   : > { %2487 = vmatmul.mubr.msk.f32.vlgmr.msra.gmra.mrb[0].mxu1 %vm557_vm2, %v527_v36  ;;  %v533_v35 = vld [vmem:[%s3769_s4] sm:$0xff] }
  0x26   : > { %646 = vmatprep.mubr.f32.mxu1 %v2850_v10  ;;  %s3781_s12 = smov (!%p367_p8, %s2470_s12), 1 }
  0x27   : > { %2611 = vmatpush1.bf16.msra.mxu0 %v2610_v27  ;;  %v2522_v27 = vld [vmem:[%s3768_s3 + $0x98] sm:$0xff]  ;;  %s2574_s29 = sshll.u32 %s3781_s12, 6 }
  0x28   : > { %2479 = vmatprep.subr.msk.mxu0 %vm423_vm0, %v385_v28  ;;  %s371_s15 = scalar_lea.vmem %s3774_s9, %s2574_s29 }
  0x29   : > { %2488 = vmatmul.mubr.msk.f32.gmra.mrb[2].mxu1 %vm557_vm2, %v528_v37  ;;  %v534_v37 = vld [vmem:[%s3769_s4 + $0x8] sm:$0xff] }
  0x2a   : > { %652 = vmatprep.mubr.f32.mxu1 %v2850_v10 }
  0x2b   : > { %2480 = vmatpush1.msk.msra.mxu0 %vm423_vm0, %v384_v29 }
  0x2c   : > { %2481 = vmatmul.mubr.msk.f32.vlgmr.msra.gmra.mrb[0].mxu0 %vm410_vm1, %v372_v30 }
  0x2d   : > { %500 = vmatprep.mubr.f32.mxu0 %v2850_v10  ;;  %2489 = vmatmul.mubr.msk.f32.gmra.mrb[4].mxu1 %vm557_vm2, %v529_v38 }
  0x2e   : > { %658 = vmatprep.mubr.f32.mxu1 %v2850_v10 }
  0x30   : > { %2482 = vmatmul.mubr.msk.f32.gmra.mrb[2].mxu0 %vm410_vm1, %v373_v31 }
  0x31   : > { %506 = vmatprep.mubr.f32.mxu0 %v2850_v10  ;;  %2490 = vmatmul.mubr.msk.f32.gmra.mrb[6].mxu1 %vm557_vm2, %v530_v39 }
  0x32   : > { %1442 = vmatprep.mubr.f32.mxu1 %v2850_v10 }
  0x34   : > { %2483 = vmatmul.mubr.msk.f32.gmra.mrb[4].mxu0 %vm410_vm1, %v374_v32 }
  0x35   : > { %512 = vmatprep.mubr.f32.mxu0 %v2850_v10 }
  0x38   : > { %2484 = vmatmul.mubr.msk.f32.gmra.mrb[6].mxu0 %vm410_vm1, %v375_v33 }
  0x39   : > { %811 = vmatprep.mubr.f32.mxu0 %v2850_v10 }
  0x9c   : > { %v393_v41 = vpop.permute.xlu0 %392  ;;  %v403_v54 = vpop.permute.xlu1 %402 }
  0xa0   : > { %v398_v49 = vpop.permute.xlu0 %397  ;;  %v408_v5 = vpop.permute.xlu1 %407 }
  0xf8   : > { %v3188_v34 = vpop.f32.mrb[0].mxu1 }
  0xf9   : > { %v3198_v38 = vpop.f32.mrb[1].mxu1 }
  0xff   : > { %v496_v43 = vpop.f32.mrb[0].mxu0 }
 0x100   : > { %v497_v44 = vadd.f32 %v496_v43, %v393_v41  ;;  %v498_v45 = vpop.f32.mrb[1].mxu0  ;;  %v3206_v43 = vpop.f32.mrb[2].mxu1 }
 0x101   : > { %v499_v46 = vadd.f32 %v498_v45, %v393_v41  ;;  %v535_v45 = vld [vmem:[%s3769_s4 + $0x10] sm:$0xff] }
 0x102   : > { %v3016_v48 = vmax.f32 %v497_v44, 0.0  ;;  %v3208_v44 = vpop.f32.mrb[3].mxu1 }
 0x103   : > { %v3023_v51 = vmax.f32 %v499_v46, 0.0  ;;  %v502_v52 = vpop.f32.mrb[2].mxu0  ;;  %v3213_v46 = vpop.f32.mrb[4].mxu1 }
 0x104   : > { %v503_v55 = vadd.f32 %v502_v52, %v398_v49  ;;  %v504_v56 = vpop.f32.mrb[3].mxu0  ;;  %689 = vrot.lane.b32.xlu0 %v3016_v48, %s2852_s23  ;;  %v1353_v6 = vmul.f32 %v1348_v60, %v3016_v48 }
 0x105   : > { %v505_v57 = vadd.f32 %v504_v56, %v398_v49  ;;  %1477 = vrot.lane.b32.xlu1 %v3023_v51, %s2853_s24  ;;  %v1354_v2 = vmul.f32 %v1352_v58, %v3023_v51  ;;  %v3218_v49 = vpop.f32.mrb[5].mxu1 }
 0x106   : > { %v3035_v59 = vmax.f32 %v503_v55, 0.0  ;;  %v3222_v52 = vpop.f32.mrb[6].mxu1 }
 0x107   : > { %v3038_v61 = vmax.f32 %v505_v57, 0.0  ;;  %v508_v62 = vpop.f32.mrb[4].mxu0  ;;  %v3225_v55 = vpop.f32.mrb[7].mxu1 }
 0x108   : > { %1475 = vrot.lane.b32.xlu0 %v3016_v48, %s2853_s24  ;;  %v1355_v63 = vmul.f32 %v1348_v60, %v3035_v59  ;;  %v509_v0 = vadd.f32 %v508_v62, %v403_v54  ;;  %v510_v1 = vpop.f32.mrb[5].mxu0 }
 0x109   : > { %1644 = vrot.lane.b32.xlu1 %v3023_v51, %s2854_s25  ;;  %v1356_v3 = vmul.f32 %v1352_v58, %v3038_v61  ;;  %v511_v4 = vadd.f32 %v510_v1, %v403_v54  ;;  %v716_v54 = vsub.s32 0, %v3013_v42 }
 0x10a   : > { %v3048_v7 = vmax.f32 %v509_v0, 0.0  ;;  %v2646_v12 = vpack.c.bf16 %v1355_v63, %v1353_v6 }
 0x10b   : > { %v2644_v8 = vpack.c.bf16 %v1356_v3, %v1354_v2  ;;  %v3050_v9 = vmax.f32 %v511_v4, 0.0  ;;  %v514_v11 = vpop.f32.mrb[6].mxu0 }
 0x10c   : > { %856 = vrot.lane.b32.xlu0 %v3016_v48, %s2855_s26  ;;  %v515_v13 = vadd.f32 %v514_v11, %v408_v5  ;;  %v516_v14 = vpop.f32.mrb[7].mxu0  ;;  %v1357_v17 = vmul.f32 %v1348_v60, %v3048_v7 }
 0x10d   : > { %1811 = vrot.lane.b32.xlu1 %v3023_v51, %s2856_s27  ;;  %2645 = vmatprep.subr.bf16.mxu1 %v2644_v8  ;;  %v517_v15 = vadd.f32 %v516_v14, %v408_v5  ;;  %v1358_v19 = vmul.f32 %v1352_v58, %v3050_v9 }
 0x10e   : > { %2647 = vmatpush1.bf16.msra.mxu1 %v2646_v12  ;;  %v3056_v16 = vmax.f32 %v515_v13, 0.0  ;;  %v1514_v13 = vsub.s32 5, %v3013_v42 }
 0x10f   : > { %v3059_v18 = vmax.f32 %v517_v15, 0.0 }
 0x110   : > { %1642 = vrot.lane.b32.xlu0 %v3016_v48, %s2854_s25  ;;  %v1359_v20 = vmul.f32 %v1348_v60, %v3056_v16  ;;  %v3234_v60 = vrot.slane %v3028_v53, %v716_v54 }
 0x111   : > { %691 = vrot.lane.b32.xlu1 %v3035_v59, %s2852_s23  ;;  %v1360_v21 = vmul.f32 %v1352_v58, %v3059_v18 }
 0x112   : > { %v2650_v22 = vpack.c.bf16 %v1359_v20, %v1357_v17  ;;  %v3254_v17 = vrot.slane %v3021_v50, %v1514_v13  ;;  %v1050_v20 = vsub.s32 2, %v3013_v42 }
 0x113   : > { %v2648_v23 = vpack.c.bf16 %v1360_v21, %v1358_v19 }
 0x114   : > { %1023 = vrot.lane.b32.xlu0 %v3016_v48, %s2857_s28 }
 0x115   : > { %858 = vrot.lane.b32.xlu1 %v3035_v59, %s2855_s26  ;;  %2649 = vmatprep.subr.bf16.mxu1 %v2648_v23 }
 0x116   : > { %2651 = vmatpush1.bf16.msra.mxu1 %v2650_v22 }
 0x118   : > { %1809 = vrot.lane.b32.xlu0 %v3016_v48, %s2856_s27 }
 0x119   : > { %1025 = vrot.lane.b32.xlu1 %v3035_v59, %s2857_s28  ;;  %2523 = vmatmul.mubr.msk.f32.vlgmr.msra.gmra.mrb[8].mxu1 %vm734_vm3, %v2519_v24 }
 0x11a   : > { %1448 = vmatprep.mubr.f32.mxu1 %v2850_v10 }
 0x11c   : > { %673 = vrot.lane.b32.xlu0 %v3023_v51, %s2852_s23 }
 0x11d   : > { %675 = vrot.lane.b32.xlu1 %v3038_v61, %s2852_s23  ;;  %2524 = vmatmul.mubr.msk.f32.gmra.mrb[10].mxu1 %vm734_vm3, %v2520_v25 }
 0x11e   : > { %1454 = vmatprep.mubr.f32.mxu1 %v2850_v10 }
 0x120   : > { %844 = vrot.lane.b32.xlu0 %v3023_v51, %s2855_s26 }
 0x121   : > { %1481 = vrot.lane.b32.xlu1 %v3038_v61, %s2853_s24  ;;  %2525 = vmatmul.mubr.msk.f32.gmra.mrb[12].mxu1 %vm734_vm3, %v2521_v26 }
 0x122   : > { %1460 = vmatprep.mubr.f32.mxu1 %v2850_v10 }
 0x124   : > { %1011 = vrot.lane.b32.xlu0 %v3023_v51, %s2857_s28 }
 0x125   : > { %846 = vrot.lane.b32.xlu1 %v3038_v61, %s2855_s26  ;;  %2526 = vmatmul.mubr.msk.f32.gmra.mrb[14].mxu1 %vm734_vm3, %v2522_v27 }
 0x126   : > { %1609 = vmatprep.mubr.f32.mxu1 %v2850_v10 }
 0x128   : > { %1479 = vrot.lane.b32.xlu0 %v3035_v59, %s2853_s24 }
 0x129   : > { %1648 = vrot.lane.b32.xlu1 %v3038_v61, %s2854_s25 }
 0x12c   : > { %1646 = vrot.lane.b32.xlu0 %v3035_v59, %s2854_s25 }
 0x12d   : > { %1013 = vrot.lane.b32.xlu1 %v3038_v61, %s2857_s28 }
 0x130   : > { %1813 = vrot.lane.b32.xlu0 %v3035_v59, %s2856_s27 }
 0x131   : > { %1815 = vrot.lane.b32.xlu1 %v3038_v61, %s2856_s27 }
 0x134   : > { %693 = vrot.lane.b32.xlu0 %v3048_v7, %s2852_s23 }
 0x135   : > { %1485 = vrot.lane.b32.xlu1 %v3050_v9, %s2853_s24 }
 0x138   : > { %1483 = vrot.lane.b32.xlu0 %v3048_v7, %s2853_s24 }
 0x139   : > { %1652 = vrot.lane.b32.xlu1 %v3050_v9, %s2854_s25 }
 0x13c   : > { %860 = vrot.lane.b32.xlu0 %v3048_v7, %s2855_s26 }
 0x13d   : > { %695 = vrot.lane.b32.xlu1 %v3056_v16, %s2852_s23 }
 0x140   : > { %1650 = vrot.lane.b32.xlu0 %v3048_v7, %s2854_s25 }
 0x141   : > { %1819 = vrot.lane.b32.xlu1 %v3050_v9, %s2856_s27 }
 0x144   : > { %677 = vrot.lane.b32.xlu0 %v3050_v9, %s2852_s23 }
 0x145   : > { %862 = vrot.lane.b32.xlu1 %v3056_v16, %s2855_s26 }
 0x148   : > { %848 = vrot.lane.b32.xlu0 %v3050_v9, %s2855_s26 }
 0x149   : > { %1029 = vrot.lane.b32.xlu1 %v3056_v16, %s2857_s28 }
 0x14c   : > { %1015 = vrot.lane.b32.xlu0 %v3050_v9, %s2857_s28 }
 0x14d   : > { %679 = vrot.lane.b32.xlu1 %v3059_v18, %s2852_s23 }
 0x150   : > { %1487 = vrot.lane.b32.xlu0 %v3056_v16, %s2853_s24 }
 0x151   : > { %1489 = vrot.lane.b32.xlu1 %v3059_v18, %s2853_s24 }
 0x154   : > { %1027 = vrot.lane.b32.xlu0 %v3048_v7, %s2857_s28 }
 0x155   : > { %1180 = vrot.lane.b32.xlu1 %v3038_v61, %s2858_s21 }
 0x158   : > { %1817 = vrot.lane.b32.xlu0 %v3048_v7, %s2856_s27 }
 0x159   : > { %1192 = vrot.lane.b32.xlu1 %v3035_v59, %s2858_s21 }
 0x15c   : > { %1178 = vrot.lane.b32.xlu0 %v3023_v51, %s2858_s21 }
 0x15d   : > { %850 = vrot.lane.b32.xlu1 %v3059_v18, %s2855_s26 }
 0x160   : > { %1654 = vrot.lane.b32.xlu0 %v3056_v16, %s2854_s25 }
 0x161   : > { %1656 = vrot.lane.b32.xlu1 %v3059_v18, %s2854_s25 }
 0x164   : > { %1821 = vrot.lane.b32.xlu0 %v3056_v16, %s2856_s27 }
 0x165   : > { %1978 = vrot.lane.b32.xlu1 %v3023_v51, %s2859_s22 }
 0x168   : > { %1190 = vrot.lane.b32.xlu0 %v3016_v48, %s2858_s21 }
 0x169   : > { %1982 = vrot.lane.b32.xlu1 %v3038_v61, %s2859_s22  ;;  %v3237_v61 = vrot.slane %v3021_v50, %v716_v54 }
 0x16c   : > { %1976 = vrot.lane.b32.xlu0 %v3016_v48, %s2859_s22  ;;  %v536_v48 = vld [vmem:[%s3769_s4 + $0x18] sm:$0xff] }
 0x16d   : > { %1017 = vrot.lane.b32.xlu1 %v3059_v18, %s2857_s28 }
 0x170   : > { %1980 = vrot.lane.b32.xlu0 %v3035_v59, %s2859_s22 }
 0x171   : > { %1823 = vrot.lane.b32.xlu1 %v3059_v18, %s2856_s27 }
 0x174   : > { %1182 = vrot.lane.b32.xlu0 %v3050_v9, %s2858_s21 }
 0x175   : > { %1196 = vrot.lane.b32.xlu1 %v3056_v16, %s2858_s21 }
 0x176   : > { %v690_v28 = vpop.permute.xlu0 %689 }
 0x177   : > { %v3178_v29 = vpop.permute.xlu1 %1477 }
 0x178   : > { %1194 = vrot.lane.b32.xlu0 %v3048_v7, %s2858_s21 }
 0x179   : > { %1986 = vrot.lane.b32.xlu1 %v3050_v9, %s2859_s22 }
 0x17a   : > { %v3182_v30 = vpop.permute.xlu0 %1475 }
 0x17b   : > { %v1645_v31 = vpop.permute.xlu1 %1644  ;;  %v1508_v19 = vsel %vm1491_vm7, %v3178_v29, %v3182_v30 }
 0x17c   : > { %1984 = vrot.lane.b32.xlu0 %v3048_v7, %s2859_s22  ;;  %v1521_v26 = vmul.f32 %v3254_v17, %v1508_v19 }
 0x17d   : > { %1184 = vrot.lane.b32.xlu1 %v3059_v18, %s2858_s21 }
 0x17e   : > { %v3186_v32 = vpop.permute.xlu0 %856 }
 0x17f   : > { %v1812_v33 = vpop.permute.xlu1 %1811 }
 0x180   : > { %1988 = vrot.lane.b32.xlu0 %v3056_v16, %s2859_s22  ;;  %v3251_v16 = vrot.slane %v3028_v53, %v1514_v13  ;;  %v883_v13 = vsub.s32 1, %v3013_v42 }
 0x181   : > { %1990 = vrot.lane.b32.xlu1 %v3059_v18, %s2859_s22  ;;  %v1492_v18 = vsel %vm1491_vm7, %v3182_v30, %v3178_v29  ;;  %v3272_v29 = vrot.slane %v3028_v53, %v1050_v20  ;;  %v3275_v30 = vrot.slane %v3021_v50, %v1050_v20 }
 0x182   : > { %v1643_v36 = vpop.permute.xlu0 %1642  ;;  %v1520_v25 = vmul.f32 %v3251_v16, %v1492_v18  ;;  %v3315_v19 = vrot.slane %v3021_v50, %v883_v13 }
 0x183   : > { %v3201_v39 = vsel %vm1658_vm4, %v1643_v36, %v1645_v31  ;;  %v3204_v40 = vsel %vm1658_vm4, %v1645_v31, %v1643_v36  ;;  %v692_v41 = vpop.permute.xlu1 %691 }
 0x184   : > { %539 = vperm.xlu0 %2808, %v533_v35  }
 0x185   : > { %544 = vperm.xlu1 %2809, %v534_v37  }
 0x186   : > { %v1024_v47 = vpop.permute.xlu0 %1023 }
 0x187   : > { %v3220_v51 = vpop.permute.xlu1 %858 }
 0x188   : > { %549 = vperm.xlu0 %2808, %v535_v45  }
 0x189   : > { %554 = vperm.xlu1 %2809, %v536_v48  }
 0x18a   : > { %v1810_v56 = vpop.permute.xlu0 %1809 }
 0x18b   : > { %v3228_v57 = vsel %vm1825_vm5, %v1810_v56, %v1812_v33  ;;  %v3231_v58 = vsel %vm1825_vm5, %v1812_v33, %v1810_v56  ;;  %v1026_v59 = vpop.permute.xlu1 %1025 }
 0x18e   : > { %v674_v62 = vpop.permute.xlu0 %673 }
 0x18f   : > { %v698_v63 = vsel %vm697_vm6, %v690_v28, %v674_v62  ;;  %v710_v0 = vsel %vm697_vm6, %v674_v62, %v690_v28  ;;  %v676_v1 = vpop.permute.xlu1 %675 }
 0x190   : > { %v722_v2 = vmul.f32 %v3234_v60, %v710_v0  ;;  %v723_v3 = vmul.f32 %v3237_v61, %v698_v63  ;;  %v699_v4 = vsel %vm697_vm6, %v692_v41, %v676_v1  ;;  %v711_v5 = vsel %vm697_vm6, %v676_v1, %v692_v41 }
 0x191   : > { %v724_v6 = vmul.f32 %v3234_v60, %v711_v5  ;;  %v725_v7 = vmul.f32 %v3237_v61, %v699_v4 }
 0x192   : > { %v3247_v8 = vpop.permute.xlu0 %844 }
 0x193   : > { %v2614_v9 = vpack.c.bf16 %v724_v6, %v722_v2  ;;  %v1482_v11 = vpop.permute.xlu1 %1481  ;;  %v2612_v12 = vpack.c.bf16 %v725_v7, %v723_v3 }
 0x195   : > { %2613 = vmatprep.subr.bf16.mxu0 %v2612_v12 }
 0x196   : > { %2615 = vmatpush1.bf16.msra.mxu0 %v2614_v9  ;;  %v1012_v14 = vpop.permute.xlu0 %1011 }
 0x197   : > { %v847_v15 = vpop.permute.xlu1 %846  ;;  %v1032_v31 = vsel %vm1031_vm8, %v1024_v47, %v1012_v14  ;;  %v1044_v33 = vsel %vm1031_vm8, %v1012_v14, %v1024_v47 }
 0x198   : > { %v3282_v54 = vmul.f32 %v3272_v29, %v1044_v33  ;;  %v3285_v56 = vmul.f32 %v3275_v30, %v1032_v31 }
 0x19a   : > { %v1480_v21 = vpop.permute.xlu0 %1479 }
 0x19b   : > { %v1493_v22 = vsel %vm1491_vm7, %v1480_v21, %v1482_v11  ;;  %v1509_v23 = vsel %vm1491_vm7, %v1482_v11, %v1480_v21  ;;  %v3265_v24 = vpop.permute.xlu1 %1648  ;;  %v865_v21 = vsel %vm864_vm9, %v3186_v32, %v3247_v8 }
 0x19c   : > { %v1522_v27 = vmul.f32 %v3251_v16, %v1493_v22  ;;  %v1523_v28 = vmul.f32 %v3254_v17, %v1509_v23  ;;  %v866_v22 = vsel %vm864_vm9, %v3220_v51, %v847_v15  ;;  %v1681_v23 = vsub.s32 6, %v3013_v42 }
 0x19d   : > { %v890_v31 = vmul.f32 %v3315_v19, %v865_v21  ;;  %v892_v33 = vmul.f32 %v3315_v19, %v866_v22 }
 0x19e   : > { %v2654_v35 = vpack.c.bf16 %v1522_v27, %v1520_v25  ;;  %v1647_v36 = vpop.permute.xlu0 %1646  ;;  %v2652_v37 = vpack.c.bf16 %v1523_v28, %v1521_v26  ;;  %v3330_v28 = vrot.slane %v3028_v53, %v883_v13  ;;  %v3345_v22 = vrot.slane %v3021_v50, %v1681_v23 }
 0x19f   : > { %v1014_v41 = vpop.permute.xlu1 %1013 }
 0x1a0   : > { %v1033_v45 = vsel %vm1031_vm8, %v1026_v59, %v1014_v41  ;;  %v1045_v48 = vsel %vm1031_vm8, %v1014_v41, %v1026_v59  ;;  %2653 = vmatprep.subr.bf16.mxu1 %v2652_v37  ;;  %v878_v37 = vsel %vm864_vm9, %v847_v15, %v3220_v51  ;;  %v1676_v41 = vsel %vm1658_vm4, %v3265_v24, %v1647_v36 }
 0x1a1   : > { %v3288_v62 = vmul.f32 %v3272_v29, %v1045_v48  ;;  %v3291_v47 = vmul.f32 %v3275_v30, %v1033_v45  ;;  %2655 = vmatpush1.bf16.msra.mxu1 %v2654_v35  ;;  %v877_v51 = vsel %vm864_vm9, %v3247_v8, %v3186_v32 }
 0x1a2   : > { %v3293_v63 = vpop.permute.xlu0 %1813 }
 0x1a3   : > { %v3297_v59 = vpop.permute.xlu1 %1815 }
 0x1a6   : > { %v694_v2 = vpop.permute.xlu0 %693 }
 0x1a7   : > { %v1486_v3 = vpop.permute.xlu1 %1485 }
 0x1aa   : > { %v1484_v4 = vpop.permute.xlu0 %1483 }
 0x1ab   : > { %v3301_v5 = vpop.permute.xlu1 %1652  ;;  %v1494_v15 = vsel %vm1491_vm7, %v1484_v4, %v1486_v3  ;;  %v1510_v0 = vsel %vm1491_vm7, %v1486_v3, %v1484_v4 }
 0x1ac   : > { %v1524_v8 = vmul.f32 %v3251_v16, %v1494_v15  ;;  %v1525_v3 = vmul.f32 %v3254_v17, %v1510_v0 }
 0x1ae   : > { %v3303_v6 = vpop.permute.xlu0 %860 }
 0x1af   : > { %v696_v7 = vpop.permute.xlu1 %695 }
 0x1b2   : > { %v3305_v9 = vpop.permute.xlu0 %1650 }
 0x1b3   : > { %v3307_v11 = vpop.permute.xlu1 %1819 }
 0x1b6   : > { %v678_v12 = vpop.permute.xlu0 %677 }
 0x1b7   : > { %v3310_v14 = vpop.permute.xlu1 %862  ;;  %v700_v25 = vsel %vm697_vm6, %v694_v2, %v678_v12  ;;  %v712_v26 = vsel %vm697_vm6, %v678_v12, %v694_v2 }
 0x1b8   : > { %v726_v2 = vmul.f32 %v3234_v60, %v712_v26  ;;  %v727_v12 = vmul.f32 %v3237_v61, %v700_v25  ;;  %v891_v26 = vmul.f32 %v3330_v28, %v878_v37 }
 0x1ba   : > { %v3312_v18 = vpop.permute.xlu0 %848 }
 0x1bb   : > { %v3317_v20 = vpop.permute.xlu1 %1029 }
 0x1be   : > { %v3327_v27 = vpop.permute.xlu0 %1015 }
 0x1bf   : > { %v680_v35 = vpop.permute.xlu1 %679 }
 0x1c0   : > { %v701_v45 = vsel %vm697_vm6, %v696_v7, %v680_v35  ;;  %v713_v48 = vsel %vm697_vm6, %v680_v35, %v696_v7 }
 0x1c1   : > { %v728_v13 = vmul.f32 %v3234_v60, %v713_v48  ;;  %v729_v21 = vmul.f32 %v3237_v61, %v701_v45  ;;  %v2620_v60 = vpack.c.bf16 %v892_v33, %v890_v31  ;;  %v1660_v61 = vsel %vm1658_vm4, %v1647_v36, %v3265_v24  ;;  %v730_v36 = vld [vmem:[%s3768_s3] sm:$0xff] }
 0x1c2   : > { %v1488_v7 = vpop.permute.xlu0 %1487  ;;  %v1690_v45 = vmul.f32 %v3345_v22, %v1676_v41  ;;  %v1682_v31 = vrot.slane %v3028_v53, %v1681_v23  ;;  %v889_v33 = vmul.f32 %v3330_v28, %v877_v51  ;;  %v1688_v41 = vmul.f32 %v3345_v22, %v3204_v40  ;;  %v731_v40 = vld [vmem:[%s3768_s3 + $0x8] sm:$0xff] }
 0x1c3   : > { %v2618_v35 = vpack.c.bf16 %v728_v13, %v726_v2  ;;  %v1490_v25 = vpop.permute.xlu1 %1489  ;;  %v2616_v1 = vpack.c.bf16 %v729_v21, %v727_v12  ;;  %v2527_v21 = vld [vmem:[%s3768_s3 + $0xa0] sm:$0xff] }
 0x1c4   : > { %v1495_v48 = vsel %vm1491_vm7, %v1488_v7, %v1490_v25  ;;  %v1511_v32 = vsel %vm1491_vm7, %v1490_v25, %v1488_v7  ;;  %v2660_v23 = vpack.c.bf16 %v1690_v45, %v1688_v41  ;;  %v1687_v12 = vmul.f32 %v1682_v31, %v3201_v39  ;;  %v2528_v25 = vld [vmem:[%s3768_s3 + $0xa8] sm:$0xff] }
 0x1c5   : > { %v1526_v4 = vmul.f32 %v3251_v16, %v1495_v48  ;;  %v1527_v37 = vmul.f32 %v3254_v17, %v1511_v32  ;;  %2617 = vmatprep.subr.bf16.mxu0 %v2616_v1  ;;  %v2622_v17 = vpack.c.bf16 %v891_v26, %v889_v33  ;;  %v1689_v1 = vmul.f32 %v1682_v31, %v1660_v61 }
 0x1c6   : > { %2619 = vmatpush1.bf16.msra.mxu0 %v2618_v35  ;;  %v3364_v24 = vpop.permute.xlu0 %1027  ;;  %v879_v39 = vsel %vm864_vm9, %v3312_v18, %v3303_v6  ;;  %v867_v7 = vsel %vm864_vm9, %v3303_v6, %v3312_v18  ;;  %v732_v35 = vld [vmem:[%s3768_s3 + $0x10] sm:$0xff]  ;;  %v1661_v6 = vsel %vm1658_vm4, %v3305_v9, %v3301_v5 }
 0x1c7   : > { %v2658_v0 = vpack.c.bf16 %v1526_v4, %v1524_v8  ;;  %v3371_v2 = vpop.permute.xlu1 %1180  ;;  %2621 = vmatprep.subr.bf16.mxu0 %v2620_v60  ;;  %v2656_v16 = vpack.c.bf16 %v1527_v37, %v1525_v3  ;;  %v2662_v15 = vpack.c.bf16 %v1689_v1, %v1687_v12  ;;  %v1848_v60 = vsub.s32 7, %v3013_v42 }
 0x1c8   : > { %v893_v18 = vmul.f32 %v3330_v28, %v879_v39  ;;  %v894_v32 = vmul.f32 %v3315_v19, %v867_v7  ;;  %v1677_v4 = vsel %vm1658_vm4, %v3301_v5, %v3305_v9  ;;  %v2529_v5 = vld [vmem:[%s3768_s3 + $0xb0] sm:$0xff]  ;;  %v1691_v41 = vmul.f32 %v1682_v31, %v1661_v6 }
 0x1c9   : > { %2491 = vmatmul.mubr.msk.f32.vlgmr.msra.gmra.mrb[8].mxu0 %vm734_vm3, %v730_v36  ;;  %2657 = vmatprep.subr.bf16.mxu1 %v2656_v16  ;;  %v3433_v9 = vrot.slane %v3021_v50, %v1848_v60  ;;  %v1827_v12 = vsel %vm1825_vm5, %v3293_v63, %v3297_v59 }
 0x1ca   : > { %2623 = vmatpush1.bf16.msra.mxu0 %v2622_v17  ;;  %v3375_v13 = vpop.permute.xlu0 %1817  ;;  %2659 = vmatpush1.bf16.msra.mxu1 %v2658_v0  ;;  %v1692_v17 = vmul.f32 %v3345_v22, %v1677_v4 }
 0x1cb   : > { %v3383_v51 = vpop.permute.xlu1 %1192  ;;  %2661 = vmatprep.subr.bf16.mxu1 %v2660_v23  ;;  %817 = vmatprep.mubr.f32.mxu0 %v2850_v10  ;;  %v1828_v4 = vsel %vm1825_vm5, %v3375_v13, %v3307_v11 }
 0x1cd   : > { %2492 = vmatmul.mubr.msk.f32.gmra.mrb[10].mxu0 %vm734_vm3, %v731_v40  ;;  %2531 = vmatmul.mubr.msk.f32.vlgmr.msra.gmra.mrb[8].mxu1 %vm734_vm3, %v2527_v21 }
 0x1ce   : > { %v3394_v26 = vpop.permute.xlu0 %1178  ;;  %2663 = vmatpush1.bf16.msra.mxu1 %v2662_v15  ;;  %823 = vmatprep.mubr.f32.mxu0 %v2850_v10 }
 0x1cf   : > { %v851_v61 = vpop.permute.xlu1 %850  ;;  %1615 = vmatprep.mubr.f32.mxu1 %v2850_v10 }
 0x1d0   : > { %v868_v45 = vsel %vm864_vm9, %v3310_v14, %v851_v61  ;;  %v880_v48 = vsel %vm864_vm9, %v851_v61, %v3310_v14  ;;  %v733_v14 = vld [vmem:[%s3768_s3 + $0x18] sm:$0xff] }
 0x1d1   : > { %v895_v8 = vmul.f32 %v3330_v28, %v880_v48  ;;  %v896_v3 = vmul.f32 %v3315_v19, %v868_v45  ;;  %2493 = vmatmul.mubr.msk.f32.gmra.mrb[12].mxu0 %vm734_vm3, %v732_v35  ;;  %2532 = vmatmul.mubr.msk.f32.gmra.mrb[10].mxu1 %vm734_vm3, %v2528_v25  ;;  %v1843_v19 = vsel %vm1825_vm5, %v3297_v59, %v3293_v63  ;;  %v2530_v59 = vld [vmem:[%s3768_s3 + $0xb8] sm:$0xff] }
 0x1d2   : > { %v1655_v37 = vpop.permute.xlu0 %1654  ;;  %829 = vmatprep.mubr.f32.mxu0 %v2850_v10  ;;  %1621 = vmatprep.mubr.f32.mxu1 %v2850_v10  ;;  %v1857_v40 = vmul.f32 %v3433_v9, %v1843_v19  ;;  %v3775_v63 = vpack.c.bf16 %v3291_v47, %v3285_v56  ;;  %v1855_v35 = vmul.f32 %v3433_v9, %v3231_v58  ;;  %v1217_v56 = vsub.s32 3, %v3013_v42  ;;  %v2496_v58 = vld [vmem:[%s3768_s3 + $0x28] sm:$0xff]  ;;  %v2535_v42 = vld [vmem:[%s3768_s3 + $0xc0] sm:$0xff] }
 0x1d3   : > { %v2626_v28 = vpack.c.bf16 %v895_v8, %v893_v18  ;;  %v1657_v33 = vpop.permute.xlu1 %1656  ;;  %v2624_v36 = vpack.c.bf16 %v896_v3, %v894_v32  ;;  %v3776_v47 = vpack.c.bf16 %v3288_v62, %v3282_v54  ;;  %v1046_v62 = vsel %vm1031_vm8, %v3327_v27, %v3364_v24  ;;  %v2497_v3 = vld [vmem:[%s3768_s3 + $0x30] sm:$0xff] }
 0x1d4   : > { %v1662_v0 = vsel %vm1658_vm4, %v1655_v37, %v1657_v33  ;;  %v1678_v16 = vsel %vm1658_vm4, %v1657_v33, %v1655_v37  ;;  %v2668_v61 = vpack.c.bf16 %v1857_v40, %v1855_v35  ;;  %v1034_v45 = vsel %vm1031_vm8, %v3364_v24, %v3327_v27  ;;  %v2536_v24 = vld [vmem:[%s3768_s3 + $0xc8] sm:$0xff] }
 0x1d5   : > { %v1693_v1 = vmul.f32 %v1682_v31, %v1662_v0  ;;  %v1694_v23 = vmul.f32 %v3345_v22, %v1678_v16  ;;  %2494 = vmatmul.mubr.msk.f32.gmra.mrb[14].mxu0 %vm734_vm3, %v733_v14  ;;  %2625 = vmatprep.subr.bf16.mxu0 %v2624_v36  ;;  %v2495_v31 = vld [vmem:[%s3768_s3 + $0x20] sm:$0xff]  ;;  %v3451_v22 = vrot.slane %v3028_v53, %v1848_v60 }
 0x1d6   : > { %2533 = vmatmul.mubr.msk.f32.gmra.mrb[12].mxu1 %vm734_vm3, %v2529_v5  ;;  %2627 = vmatpush1.bf16.msra.mxu0 %v2626_v28  ;;  %v3445_v21 = vpop.permute.xlu0 %1821  ;;  %v3492_v48 = vrot.slane %v3028_v53, %v1217_v56  ;;  %v3495_v32 = vrot.slane %v3021_v50, %v1217_v56  ;;  %v1844_v53 = vsel %vm1825_vm5, %v3307_v11, %v3375_v13  ;;  %v2503_v56 = vld [vmem:[%s3768_s3 + $0x40] sm:$0xff] }
 0x1d7   : > { %v2666_v15 = vpack.c.bf16 %v1693_v1, %v1691_v41  ;;  %v3453_v39 = vpop.permute.xlu1 %1978  ;;  %2629 = vmatprep.subr.bf16.mxu0 %v3775_v63  ;;  %978 = vmatprep.mubr.f32.mxu0 %v2850_v10  ;;  %v2664_v7 = vpack.c.bf16 %v1694_v23, %v1692_v17  ;;  %v1856_v25 = vmul.f32 %v3451_v22, %v1827_v12  ;;  %v2537_v23 = vld [vmem:[%s3768_s3 + $0xd0] sm:$0xff] }
 0x1d8   : > { %1627 = vmatprep.mubr.f32.mxu1 %v2850_v10  ;;  %v1854_v6 = vmul.f32 %v3451_v22, %v3228_v57  ;;  %v1200_v50 = vsel %vm1198_vm10, %v3383_v51, %v3371_v2  ;;  %v1060_v37 = vmul.f32 %v3272_v29, %v1046_v62  ;;  %v1061_v13 = vmul.f32 %v3275_v30, %v1034_v45 }
 0x1d9   : > { %2499 = vmatmul.mubr.msk.f32.vlgmr.msra.gmra.mrb[8].mxu0 %vm734_vm3, %v2495_v31  ;;  %2665 = vmatprep.subr.bf16.mxu1 %v2664_v7  ;;  %v1858_v5 = vmul.f32 %v3451_v22, %v1828_v4  ;;  %v1859_v41 = vmul.f32 %v3433_v9, %v1844_v53  ;;  %v1226_v0 = vmul.f32 %v3495_v32, %v1200_v50 }
 0x1da   : > { %2534 = vmatmul.mubr.msk.f32.gmra.mrb[14].mxu1 %vm734_vm3, %v2530_v59  ;;  %2631 = vmatpush1.bf16.msra.mxu0 %v3776_v47  ;;  %v1191_v60 = vpop.permute.xlu0 %1190  ;;  %v2670_v54 = vpack.c.bf16 %v1856_v25, %v1854_v6 }
 0x1db   : > { %2667 = vmatpush1.bf16.msra.mxu1 %v2666_v15  ;;  %v1983_v18 = vpop.permute.xlu1 %1982  ;;  %984 = vmatprep.mubr.f32.mxu0 %v2850_v10  ;;  %v1199_v57 = vsel %vm1198_vm10, %v1191_v60, %v3394_v26  ;;  %v1211_v28 = vsel %vm1198_vm10, %v3394_v26, %v1191_v60 }
 0x1dc   : > { %2669 = vmatprep.subr.bf16.mxu1 %v2668_v61  ;;  %1776 = vmatprep.mubr.f32.mxu1 %v2850_v10  ;;  %v1224_v14 = vmul.f32 %v3495_v32, %v1199_v57  ;;  %v1223_v12 = vmul.f32 %v3492_v48, %v1211_v28  ;;  %v2504_v57 = vld [vmem:[%s3768_s3 + $0x48] sm:$0xff] }
 0x1dd   : > { %2500 = vmatmul.mubr.msk.f32.gmra.mrb[10].mxu0 %vm734_vm3, %v2496_v58  ;;  %v2551_v58 = vld [vmem:[%s3773_s8 + $0x10] ss:$0 sm:$0xff] }
 0x1de   : > { %2539 = vmatmul.mubr.msk.f32.vlgmr.msra.gmra.mrb[8].mxu1 %vm734_vm3, %v2535_v42  ;;  %v1977_v8 = vpop.permute.xlu0 %1976  ;;  %990 = vmatprep.mubr.f32.mxu0 %v2850_v10 }
 0x1df   : > { %2671 = vmatpush1.bf16.msra.mxu1 %v2670_v54  ;;  %v1018_v27 = vpop.permute.xlu1 %1017  ;;  %1782 = vmatprep.mubr.f32.mxu1 %v2850_v10  ;;  %v2009_v15 = vsel %vm1992_vm11, %v3453_v39, %v1977_v8  ;;  %v1993_v6 = vsel %vm1992_vm11, %v1977_v8, %v3453_v39  ;;  %v2543_v8 = vld [vmem:[%s3768_s3 + $0xe0] sm:$0xff] }
 0x1e0   : > { %v1035_v19 = vsel %vm1031_vm8, %v3317_v20, %v1018_v27  ;;  %v1047_v11 = vsel %vm1031_vm8, %v1018_v27, %v3317_v20  ;;  %v2021_v45 = vmul.f32 %v2551_v58, %v1993_v6  ;;  %v2505_v27 = vld [vmem:[%s3768_s3 + $0x50] sm:$0xff] }
 0x1e1   : > { %v1062_v33 = vmul.f32 %v3272_v29, %v1047_v11  ;;  %v1063_v36 = vmul.f32 %v3275_v30, %v1035_v19  ;;  %2501 = vmatmul.mubr.msk.f32.gmra.mrb[12].mxu0 %vm734_vm3, %v2497_v3  ;;  %v2498_v29 = vld [vmem:[%s3768_s3 + $0x38] sm:$0xff]  ;;  %v1212_v30 = vsel %vm1198_vm10, %v3371_v2, %v3383_v51  ;;  %v2636_v2 = vpack.c.bf16 %v1226_v0, %v1224_v14 }
 0x1e2   : > { %2540 = vmatmul.mubr.msk.f32.gmra.mrb[10].mxu1 %vm734_vm3, %v2536_v24  ;;  %v1981_v20 = vpop.permute.xlu0 %1980  ;;  %996 = vmatprep.mubr.f32.mxu0 %v2850_v10  ;;  %v3551_v51 = vld [vmem:[%s3773_s8 + $0x18] ss:$0 sm:$0xff]  ;;  %v1225_v7 = vmul.f32 %v3492_v48, %v1212_v30 }
 0x1e3   : > { %v2634_v26 = vpack.c.bf16 %v1062_v33, %v1060_v37  ;;  %v2010_v16 = vsel %vm1992_vm11, %v1983_v18, %v1981_v20  ;;  %v1824_v17 = vpop.permute.xlu1 %1823  ;;  %1788 = vmatprep.mubr.f32.mxu1 %v2850_v10  ;;  %v2632_v1 = vpack.c.bf16 %v1063_v36, %v1061_v13  ;;  %v2544_v37 = vld [vmem:[%s3768_s3 + $0xe8] sm:$0xff]  ;;  %v2506_v0 = vld [vmem:[%s3768_s3 + $0x58] sm:$0xff] }
 0x1e4   : > { %v1829_v40 = vsel %vm1825_vm5, %v3445_v21, %v1824_v17  ;;  %v1845_v31 = vsel %vm1825_vm5, %v1824_v17, %v3445_v21  ;;  %v1994_v21 = vsel %vm1992_vm11, %v1981_v20, %v1983_v18  ;;  %v2024_v35 = vmul.f32 %v3551_v51, %v2010_v16 }
 0x1e5   : > { %v1860_v63 = vmul.f32 %v3451_v22, %v1829_v40  ;;  %v1861_v59 = vmul.f32 %v3433_v9, %v1845_v31  ;;  %2502 = vmatmul.mubr.msk.f32.gmra.mrb[14].mxu0 %vm734_vm3, %v2498_v29  ;;  %2633 = vmatprep.subr.bf16.mxu0 %v2632_v1  ;;  %v2538_v9 = vld [vmem:[%s3768_s3 + $0xd8] sm:$0xff]  ;;  %v2638_v61 = vpack.c.bf16 %v1225_v7, %v1223_v12  ;;  %v2511_v12 = vld [vmem:[%s3768_s3 + $0x60] sm:$0xff] }
 0x1e6   : > { %2541 = vmatmul.mubr.msk.f32.gmra.mrb[12].mxu1 %vm734_vm3, %v2537_v23  ;;  %2635 = vmatpush1.bf16.msra.mxu0 %v2634_v26  ;;  %v1183_v25 = vpop.permute.xlu0 %1182  ;;  %v2022_v18 = vmul.f32 %v3551_v51, %v2009_v15  ;;  %v2023_v42 = vmul.f32 %v2551_v58, %v1994_v21  ;;  %v2546_v31 = vld [vmem:[%s3768_s3 + $0xf8] sm:$0xff]  ;;  %v2553_v15 = vld [vmem:[%s3768_s3 + $0x100] sm:$0xff]  ;;  %v2555_v21 = vld [vmem:[%s3768_s3 + $0x110] sm:$0xff] }
 0x1e7   : > { %v2674_v22 = vpack.c.bf16 %v1860_v63, %v1858_v5  ;;  %v1197_v47 = vpop.permute.xlu1 %1196  ;;  %2637 = vmatprep.subr.bf16.mxu0 %v2636_v2  ;;  %1145 = vmatprep.mubr.f32.mxu0 %v2850_v10  ;;  %v2672_v60 = vpack.c.bf16 %v1861_v59, %v1859_v41  ;;  %v2513_v63 = vld [vmem:[%s3768_s3 + $0x70] sm:$0xff]  ;;  %v2554_v59 = vld [vmem:[%s3768_s3 + $0x108] sm:$0xff]  ;;  %v2514_v7 = vld [vmem:[%s3768_s3 + $0x78] sm:$0xff] }
 0x1e8   : > { %1794 = vmatprep.mubr.f32.mxu1 %v2850_v10  ;;  %v2676_v62 = vpack.c.bf16 %v2024_v35, %v2022_v18  ;;  %v2678_v3 = vpack.c.bf16 %v2023_v42, %v2021_v45  ;;  %v2556_v35 = vld [vmem:[%s3768_s3 + $0x118] sm:$0xff] }
 0x1e9   : > { %2507 = vmatmul.mubr.msk.f32.vlgmr.msra.gmra.mrb[8].mxu0 %vm734_vm3, %v2503_v56  ;;  %2673 = vmatprep.subr.bf16.mxu1 %v2672_v60 }
 0x1ea   : > { %2542 = vmatmul.mubr.msk.f32.gmra.mrb[14].mxu1 %vm734_vm3, %v2538_v9  ;;  %2639 = vmatpush1.bf16.msra.mxu0 %v2638_v61  ;;  %v1195_v54 = vpop.permute.xlu0 %1194 }
 0x1eb   : > { %2675 = vmatpush1.bf16.msra.mxu1 %v2674_v22  ;;  %v1987_v39 = vpop.permute.xlu1 %1986  ;;  %1151 = vmatprep.mubr.f32.mxu0 %v2850_v10  ;;  %v1213_v4 = vsel %vm1198_vm10, %v1183_v25, %v1195_v54  ;;  %v1201_v53 = vsel %vm1198_vm10, %v1195_v54, %v1183_v25 }
 0x1ec   : > { %2677 = vmatprep.subr.bf16.mxu1 %v2676_v62  ;;  %1943 = vmatprep.mubr.f32.mxu1 %v2850_v10  ;;  %v1227_v14 = vmul.f32 %v3492_v48, %v1213_v4  ;;  %v1228_v13 = vmul.f32 %v3495_v32, %v1201_v53 }
 0x1ed   : > { %2508 = vmatmul.mubr.msk.f32.gmra.mrb[10].mxu0 %vm734_vm3, %v2504_v57 }
 0x1ee   : > { %2547 = vmatmul.mubr.msk.f32.vlgmr.msra.gmra.mrb[8].mxu1 %vm734_vm3, %v2543_v8  ;;  %v1985_v50 = vpop.permute.xlu0 %1984  ;;  %1157 = vmatprep.mubr.f32.mxu0 %v2850_v10 }
 0x1ef   : > { %2679 = vmatpush1.bf16.msra.mxu1 %v2678_v3  ;;  %v1185_v24 = vpop.permute.xlu1 %1184  ;;  %1949 = vmatprep.mubr.f32.mxu1 %v2850_v10  ;;  %v1995_v28 = vsel %vm1992_vm11, %v1985_v50, %v1987_v39  ;;  %v2011_v5 = vsel %vm1992_vm11, %v1987_v39, %v1985_v50 }
 0x1f0   : > { %v1202_v19 = vsel %vm1198_vm10, %v1197_v47, %v1185_v24  ;;  %v1214_v11 = vsel %vm1198_vm10, %v1185_v24, %v1197_v47  ;;  %v2025_v30 = vmul.f32 %v2551_v58, %v1995_v28  ;;  %v2026_v17 = vmul.f32 %v3551_v51, %v2011_v5 }
 0x1f1   : > { %v1229_v33 = vmul.f32 %v3492_v48, %v1214_v11  ;;  %v1230_v36 = vmul.f32 %v3495_v32, %v1202_v19  ;;  %2509 = vmatmul.mubr.msk.f32.gmra.mrb[12].mxu0 %vm734_vm3, %v2505_v27  ;;  %v2545_v32 = vld [vmem:[%s3768_s3 + $0xf0] sm:$0xff] }
 0x1f2   : > { %2548 = vmatmul.mubr.msk.f32.gmra.mrb[10].mxu1 %vm734_vm3, %v2544_v37  ;;  %v1989_v41 = vpop.permute.xlu0 %1988  ;;  %1163 = vmatprep.mubr.f32.mxu0 %v2850_v10 }
 0x1f3   : > { %v2642_v20 = vpack.c.bf16 %v1229_v33, %v1227_v14  ;;  %v1991_v29 = vpop.permute.xlu1 %1990  ;;  %1955 = vmatprep.mubr.f32.mxu1 %v2850_v10  ;;  %v2640_v48 = vpack.c.bf16 %v1230_v36, %v1228_v13 }
 0x1f4   : > { %v1996_v26 = vsel %vm1992_vm11, %v1989_v41, %v1991_v29  ;;  %v2012_v16 = vsel %vm1992_vm11, %v1991_v29, %v1989_v41 }
 0x1f5   : > { %v2027_v1 = vmul.f32 %v2551_v58, %v1996_v26  ;;  %v2028_v23 = vmul.f32 %v3551_v51, %v2012_v16  ;;  %2510 = vmatmul.mubr.msk.f32.gmra.mrb[14].mxu0 %vm734_vm3, %v2506_v0  ;;  %2641 = vmatprep.subr.bf16.mxu0 %v2640_v48  ;;  %v2512_v51 = vld [vmem:[%s3768_s3 + $0x68] sm:$0xff] }
 0x1f6   : > { %2549 = vmatmul.mubr.msk.f32.gmra.mrb[12].mxu1 %vm734_vm3, %v2545_v32  ;;  %2643 = vmatpush1.bf16.msra.mxu0 %v2642_v20 }
 0x1f7   : > { %v2682_v40 = vpack.c.bf16 %v2027_v1, %v2025_v30  ;;  %1312 = vmatprep.mubr.f32.mxu0 %v2850_v10  ;;  %1961 = vmatprep.mubr.f32.mxu1 %v2850_v10  ;;  %v2680_v2 = vpack.c.bf16 %v2028_v23, %v2026_v17 }
 0x1f9   : > { %2515 = vmatmul.mubr.msk.f32.vlgmr.msra.gmra.mrb[8].mxu0 %vm734_vm3, %v2511_v12  ;;  %2681 = vmatprep.subr.bf16.mxu1 %v2680_v2 }
 0x1fa   : > { %2550 = vmatmul.mubr.msk.f32.gmra.mrb[14].mxu1 %vm734_vm3, %v2546_v31  ;;  %1318 = vmatprep.mubr.f32.mxu0 %v2850_v10 }
 0x1fb   : > { %2683 = vmatpush1.bf16.msra.mxu1 %v2682_v40  ;;  %2110 = vmatprep.mubr.f32.mxu1 %v2850_v10 }
 0x1fd   : > { %2516 = vmatmul.mubr.msk.f32.gmra.mrb[10].mxu0 %vm734_vm3, %v2512_v51  ;;  %v2860_v51 = vmov 0.0|0.0  }
 0x1fe   : > { %2557 = vmatmul.mubr.msk.f32.vlgmr.msra.gmra.mrb[8].mxu1 %vm734_vm3, %v2553_v15  ;;  %1324 = vmatprep.mubr.f32.mxu0 %v2850_v10 }
 0x1ff   : > { %2116 = vmatprep.mubr.f32.mxu1 %v2850_v10  ;;  %2684 = vmatprep.subr.bf16.mxu0 %v2860_v51 }
 0x201   : > { %2517 = vmatmul.mubr.msk.f32.gmra.mrb[12].mxu0 %vm734_vm3, %v2513_v63 }
 0x202   : > { %2558 = vmatmul.mubr.msk.f32.gmra.mrb[10].mxu1 %vm734_vm3, %v2554_v59  ;;  %1330 = vmatprep.mubr.f32.mxu0 %v2850_v10 }
 0x203   : > { %2122 = vmatprep.mubr.f32.mxu1 %v2850_v10  ;;  %v540_v25 = vpop.permute.xlu0 %539 }
 0x204   : > { %v643_v56 = vadd.f32 %v3188_v34, %v540_v25  ;;  %v645_v22 = vadd.f32 %v3198_v38, %v540_v25  ;;  %v545_v47 = vpop.permute.xlu1 %544 }
 0x205   : > { %2518 = vmatmul.mubr.msk.f32.gmra.mrb[14].mxu0 %vm734_vm3, %v2514_v7  ;;  %v649_v6 = vadd.f32 %v3206_v43, %v545_v47  ;;  %v651_v18 = vadd.f32 %v3208_v44, %v545_v47 }
 0x206   : > { %2559 = vmatmul.mubr.msk.f32.gmra.mrb[12].mxu1 %vm734_vm3, %v2555_v21  ;;  %2593 = vmatprep.mubr.msk.f32.mxu0 %vm2861_vm12, %v2850_v10 }
 0x207   : > { %2128 = vmatprep.mubr.f32.mxu1 %v2850_v10  ;;  %v550_v42 = vpop.permute.xlu0 %549  ;;  %v2243_v10 = vld [vmem:[%s3772_s7] sm:$0xff] }
 0x208   : > { %v655_v38 = vadd.f32 %v3213_v46, %v550_v42  ;;  %v657_v4 = vadd.f32 %v3218_v49, %v550_v42  ;;  %v555_v53 = vpop.permute.xlu1 %554  ;;  %v2246_v42 = vld [vmem:[%s3772_s7 + $0x18] sm:$0xff] }
 0x209   : > { %v661_v13 = vadd.f32 %v3222_v52, %v555_v53  ;;  %v663_v28 = vadd.f32 %v3225_v55, %v555_v53 }
 0x20a   : > { %2560 = vmatmul.mubr.msk.f32.gmra.mrb[14].mxu1 %vm734_vm3, %v2556_v35 }
 0x2cc   : > { %v1314_v9 = vpop.f32.mrb[8].mxu0 }
 0x2cd   : > { %v2691_v60 = vadd.f32 %v1314_v9, %v643_v56  ;;  %v1316_v61 = vpop.f32.mrb[9].mxu0  ;;  %v2168_v9 = vld [vmem:[%s3771_s6] sm:$0x3] }
 0x2ce   : > { %v2694_v58 = vadd.f32 %v1316_v61, %v645_v22 }
 0x2d0   : > { %v1320_v54 = vpop.f32.mrb[10].mxu0 }
 0x2d1   : > { %v2697_v62 = vadd.f32 %v1320_v54, %v649_v6  ;;  %v2112_v57 = vpop.f32.mrb[8].mxu1  ;;  %v1322_v45 = vpop.f32.mrb[11].mxu0  ;;  %v2244_v6 = vld [vmem:[%s3772_s7 + $0x8] sm:$0xff] }
 0x2d2   : > { %v3671_v39 = vadd.f32 %v2691_v60, %v2112_v57  ;;  %v2700_v8 = vadd.f32 %v1322_v45, %v651_v18  ;;  %v2114_v34 = vpop.f32.mrb[9].mxu1  ;;  %v2245_v18 = vld [vmem:[%s3772_s7 + $0x10] sm:$0xff] }
 0x2d3   : > { %v3674_v3 = vadd.f32 %v2694_v58, %v2114_v34 }
 0x2d4   : > { %v2143_v43 = vmax.f32 %v3671_v39, 0.0  ;;  %v1326_v50 = vpop.f32.mrb[12].mxu0 }
 0x2d5   : > { %v2144_v44 = vmax.f32 %v3674_v3, 0.0  ;;  %v2703_v27 = vadd.f32 %v1326_v50, %v655_v38  ;;  %v2118_v24 = vpop.f32.mrb[10].mxu1  ;;  %v1328_v37 = vpop.f32.mrb[13].mxu0 }
 0x2d6   : > { %v3679_v14 = vadd.f32 %v2697_v62, %v2118_v24  ;;  %v2706_v19 = vadd.f32 %v1328_v37, %v657_v4  ;;  %v2120_v11 = vpop.f32.mrb[11].mxu1 }
 0x2d7   : > { %v3682_v46 = vadd.f32 %v2700_v8, %v2120_v11  ;;  %v2151_v49 = vadd.f32 %v2144_v44, %v2143_v43 }
 0x2d8   : > { %v2145_v33 = vmax.f32 %v3679_v14, 0.0  ;;  %v1332_v36 = vpop.f32.mrb[14].mxu0 }
 0x2d9   : > { %v2146_v5 = vmax.f32 %v3682_v46, 0.0  ;;  %v2709_v41 = vadd.f32 %v1332_v36, %v661_v13  ;;  %2152 = vadd.xlane.f32.xlu0 %v2151_v49  ;;  %v2124_v0 = vpop.f32.mrb[12].mxu1  ;;  %v1334_v20 = vpop.f32.mrb[15].mxu0 }
 0x2da   : > { %v3691_v29 = vadd.f32 %v2703_v27, %v2124_v0  ;;  %v2712_v52 = vadd.f32 %v1334_v20, %v663_v28  ;;  %v2126_v48 = vpop.f32.mrb[13].mxu1 }
 0x2db   : > { %v3693_v32 = vadd.f32 %v2706_v19, %v2126_v48  ;;  %v2154_v55 = vadd.f32 %v2146_v5, %v2145_v33 }
 0x2dc   : > { %v2147_v30 = vmax.f32 %v3691_v29, 0.0 }
 0x2dd   : > { %v2148_v26 = vmax.f32 %v3693_v32, 0.0  ;;  %2155 = vadd.xlane.f32.xlu1 %v2154_v55  ;;  %v2130_v16 = vpop.f32.mrb[14].mxu1 }
 0x2de   : > { %v3701_v17 = vadd.f32 %v2709_v41, %v2130_v16  ;;  %v2132_v1 = vpop.f32.mrb[15].mxu1 }
 0x2df   : > { %v3703_v23 = vadd.f32 %v2712_v52, %v2132_v1  ;;  %v2157_v12 = vadd.f32 %v2148_v26, %v2147_v30 }
 0x2e0   : > { %v2149_v40 = vmax.f32 %v3701_v17, 0.0 }
 0x2e1   : > { %v2150_v31 = vmax.f32 %v3703_v23, 0.0  ;;  %2158 = vadd.xlane.f32.xlu0 %v2157_v12 }
 0x2e3   : > { %v2160_v2 = vadd.f32 %v2150_v31, %v2149_v40 }
 0x2e5   : > { %2161 = vadd.xlane.f32.xlu0 %v2160_v2 }
 0x366   : > { %v2153_v15 = vpop.xlane.xlu0 %2152 }
 0x367   : > { %v2164_v59 = vmul.f32 0.00390625, %v2153_v15 }
 0x36a   : > { %v2156_v63 = vpop.xlane.xlu1 %2155 }
 0x36b   : > { %v2165_v7 = vmul.f32 0.00390625, %v2156_v63 }
 0x36d   : > { %v2685_v21 = vpack.c.bf16 %v2165_v7, %v2164_v59 }
 0x36e   : > { %v2159_v35 = vpop.xlane.xlu0 %2158 }
 0x36f   : > { %2686 = vmatpush3.bf16.msra.mxu0 %v2685_v21  ;;  %v2166_v56 = vmul.f32 0.00390625, %v2159_v35 }
 0x370   : > { %2687 = vmatprep.subr.bf16.mxu0 %v2860_v51 }
 0x372   : > { %v2162_v25 = vpop.xlane.xlu0 %2161 }
 0x373   : > { %v2167_v22 = vmul.f32 0.00390625, %v2162_v25 }
 0x375   : > { %v2688_v47 = vpack.c.bf16 %v2167_v22, %v2166_v56 }
 0x377   : > { %2689 = vmatpush3.bf16.msra.mxu0 %v2688_v47 }
 0x37a   : > { %2594 = vmatmul.mubr.msk.f32.vlgmr.msra.gmra.mrb[16].mxu0 %vm734_vm3, %v2168_v9 }
 0x37b   : > { %2598 = vmatprep.mubr.msk.f32.mxu0 %vm2247_vm13, %v2243_v10 }
 0x44d   : > { %v2238_v60 = vpop.f32.mrb[16].mxu0 }
 0x44e   : > { %v2242_v61 = vmax.f32 %v2238_v60, 0.0  ;;  %v2595_v58 = vpop.f32.mrb[17].mxu0 }
 0x450   : > { %2596 = vmatprep.subr.msk.mxu0 %vm2260_vm14, %v2242_v61 }
 0x451   : > { %2597 = vmatpush3.msk.msra.mxu0 %vm2260_vm14, %v2242_v61 }
 0x452   : > { %2599 = vmatmul.mubr.msk.f32.vlgmr.msra.gmra.mrb[18].mxu0 %vm2247_vm13, %v2244_v6 }
 0x453   : > { %2601 = vmatprep.mubr.msk.f32.mxu0 %vm2247_vm13, %v2245_v18 }
 0x456   : > { %2602 = vmatmul.mubr.msk.f32.gmra.mrb[20].mxu0 %vm2247_vm13, %v2246_v42 }
 0x525   : > { %v2600_v54 = vpop.f32.mrb[18].mxu0 }
 0x526   : > { %v2568_v62 = vmul.f32 -1.442695, %v2600_v54  ;;  %v2330_v57 = vpop.f32.mrb[19].mxu0 }
 0x527   : > { %v2567_v45 = vmul.f32 -1.442695, %v2330_v57 }
 0x528   : > { %2810 = vpow2.f32 %v2568_v62 }
 0x529   : > { %2812 = vpow2.f32 %v2567_v45  ;;  %v2603_v8 = vpop.f32.mrb[20].mxu0 }
 0x52a   : > { %v2570_v34 = vmul.f32 -1.442695, %v2603_v8  ;;  %v2340_v38 = vpop.f32.mrb[21].mxu0 }
 0x52b   : > { %v2569_v4 = vmul.f32 -1.442695, %v2340_v38 }
 0x52c   : > { %2814 = vpow2.f32 %v2570_v34 }
 0x52d   : > { %2816 = vpow2.f32 %v2569_v4 }
 0x532   : > { %v2811_v53 = vpop.eup %2810 }
 0x533   : > { %v2813_v50 = vpop.eup %2812  ;;  %v2362_v27 = vadd.f32 1.0, %v2811_v53 }
 0x534   : > { %v2361_v24 = vadd.f32 1.0, %v2813_v50 }
 0x535   : > { %2818 = vrcp.f32 %v2362_v27 }
 0x536   : > { %v2815_v37 = vpop.eup %2814  ;;  %2820 = vrcp.f32 %v2361_v24 }
 0x537   : > { %v2817_v19 = vpop.eup %2816  ;;  %v2364_v13 = vadd.f32 1.0, %v2815_v37 }
 0x538   : > { %v2363_v11 = vadd.f32 1.0, %v2817_v19 }
 0x53a   : > { %2822 = vrcp.f32 %v2363_v11 }
 0x53b   : > { %2824 = vrcp.f32 %v2364_v13 }
 0x53f   : > { %v2819_v49 = vpop.eup %2818 }
 0x540   : > { %v2821_v28 = vpop.eup %2820  ;;  %2380 = vperm.xlu0 %2808, %v2819_v49  }
 0x541   : > { %2375 = vperm.xlu1 %2809, %v2821_v28  }
 0x544   : > { %v2823_v36 = vpop.eup %2822 }
 0x545   : > { %2385 = vperm.xlu1 %2809, %v2823_v36   ;;  %v2825_v41 = vpop.eup %2824 }
 0x549   : > { %2390 = vperm.xlu1 %2809, %v2825_v41  }
 0x5bf   : > { %v2381_v0 = vpop.permute.xlu0 %2380 }
 0x5c0   : > { %v2395_v20 = vmul.f32 %v2381_v0, %v2145_v33  ;;  %v2396_v52 = vmul.f32 %v2381_v0, %v2146_v5  ;;  %v2376_v48 = vpop.permute.xlu1 %2375 }
 0x5c1   : > { %v2393_v55 = vmul.f32 %v2376_v48, %v2143_v43  ;;  %v2394_v16 = vmul.f32 %v2376_v48, %v2144_v44 }
 0x5c2   : > { %2403 = vst [vmem:[%s371_s15 + $0x10] sm:$0xff] %v2395_v20  ;;  %2404 = vst [vmem:[%s371_s15 + $0x18] sm:$0xff] %v2396_v52 }
 0x5c3   : > { %2401 = vst [vmem:[%s371_s15] sm:$0xff] %v2393_v55  ;;  %2402 = vst [vmem:[%s371_s15 + $0x8] sm:$0xff] %v2394_v16 }
 0x5c4   : > { %v2386_v1 = vpop.permute.xlu1 %2385 }
 0x5c5   : > { %v2397_v12 = vmul.f32 %v2386_v1, %v2147_v30  ;;  %v2398_v14 = vmul.f32 %v2386_v1, %v2148_v26 }
 0x5c7   : > { %2405 = vst [vmem:[%s371_s15 + $0x20] sm:$0xff] %v2397_v12  ;;  %2406 = vst [vmem:[%s371_s15 + $0x28] sm:$0xff] %v2398_v14 }
 0x5c8   : > { %v2391_v46 = vpop.permute.xlu1 %2390 }
 0x5c9   : > { %v2399_v39 = vmul.f32 %v2391_v46, %v2149_v40  ;;  %v2400_v3 = vmul.f32 %v2391_v46, %v2150_v31 }
 0x5cb   : > { %2407 = vst [vmem:[%s371_s15 + $0x30] sm:$0xff] %v2399_v39  ;;  %2408 = vst [vmem:[%s371_s15 + $0x38] sm:$0xff] %v2400_v3 }
 0x5cc PF: > { %p16_p9 = scmp.ge.s32.totalorder %s2929_s13, 4   ;;  %s3777_s30 = smov %s2844_s10 }
 0x5cd   : > { %s3778_s10 = smov %s2938_s16  ;;  %s3779_s11 = smov %s2929_s13 }
 0x5ce   :  { %18 = sbr.rel (!%p16_p9) target bundleno = 2 (0x2), region = 122 }

</bundles_post_ra>
